<compile_context>
chip_gen: v7x
topology: tpu7x:2x2x1
jax: 0.10.0
libtpu: 0.0.40
codegen_flags: <defaults>
</compile_context>

<pallas_src>
import jax
import jax.numpy as jnp
from jax.experimental import pallas as pl
from jax.experimental.pallas import tpu as pltpu  # noqa: F401  (kept for TPU-specific tuning hooks)

# ----------------------------- model config ---------------------------------
B = 2          # batch
S = 8          # sequence length (torch code pads to max_length=512; small here)
BS = B * S     # folded batch*seq rows
H = 32         # hidden size
NH = 2         # attention heads
DH = H // NH   # head dim
FFN = 64       # FFN intermediate size
NLAYERS = 2
VOCAB = 64
EPS = 1e-12    # BERT LayerNorm eps


# --------------------------- in-kernel helpers --------------------------------
def _layernorm(x, g, b):
    mean = jnp.mean(x, axis=-1, keepdims=True)
    cen = x - mean
    var = jnp.mean(cen * cen, axis=-1, keepdims=True)
    return cen * jax.lax.rsqrt(var + EPS) * g + b


def _erf(x):
    # Abramowitz & Stegun 7.1.26 rational approximation (|err| < 1.5e-7 in
    # exact arithmetic; the approx reciprocal relaxes that to ~1e-3 relative,
    # fine for GELU).  Uses only exp / mul / add / select + one EUP recip.
    a1, a2, a3, a4, a5 = (0.254829592, -0.284496736, 1.421413741,
                          -1.453152027, 1.061405429)
    p = 0.3275911
    sgn = jnp.where(x < 0.0, -1.0, 1.0)
    z = x * sgn                                        # |x|
    t = pl.reciprocal(1.0 + p * z, approx=True)        # EUP, not VALU
    poly = ((((a5 * t + a4) * t + a3) * t + a2) * t + a1) * t
    return sgn * (1.0 - poly * jnp.exp(-z * z))


def _gelu_exact(x):
    return 0.5 * x * (1.0 + _erf(x * 0.7071067811865476))


# ----------------------------- fused encoder kernel ---------------------------
def _encoder_kernel(emb_ref, bias_ref, eg_ref, eb_ref,
                    wqkv_ref, bqkv_ref, wo_ref, bo_ref,
                    ln1g_ref, ln1b_ref,
                    w1_ref, b1_ref, w2_ref, b2_ref,
                    ln2g_ref, ln2b_ref,
                    sw_ref, sb_ref,
                    score_ref):
    """Whole batch in one shot: emb LN -> NLAYERS BERT layers -> CLS scores."""
    x = _layernorm(emb_ref[...], eg_ref[...], eb_ref[...])      # (BS, H) f32
    bias = bias_ref[...]                                         # (BS, BS) block-diag mask
    scale = 1.0 / (DH ** 0.5)

    for l in range(NLAYERS):                                     # static unroll
        # Fused QKV projection: one (BS,H) @ (H,3H) matmul, bf16 MXU inputs,
        # f32 accumulation.
        qkv = jnp.dot(x.astype(jnp.bfloat16), wqkv_ref[l],
                      preferred_element_type=jnp.float32) + bqkv_ref[l]   # (BS, 3H)

        # Per-head attention; heads are lane slices of qkv.  Head contexts are
        # concatenated on the lane axis -> ONE output-projection matmul.
        ctx_heads = []
        for h in range(NH):
            lo = h * DH
            qh = qkv[:, lo:lo + DH]                              # (BS, DH)
            kh = qkv[:, H + lo:H + lo + DH]                      # (BS, DH)
            vh = qkv[:, 2 * H + lo:2 * H + lo + DH]              # (BS, DH)

            # q @ k^T via dot_general contracting last dims (no explicit .T).
            s = jax.lax.dot_general(
                qh, kh, (((1,), (1,)), ((), ())),
                preferred_element_type=jnp.float32) * scale + bias        # (BS, BS)
            s = s - jnp.max(s, axis=-1, keepdims=True)
            p = jnp.exp(s)
            p = p * pl.reciprocal(jnp.sum(p, axis=-1, keepdims=True),
                                  approx=True)                   # EUP reciprocal
            ctx_heads.append(jnp.dot(p, vh,
                                     preferred_element_type=jnp.float32))  # (BS, DH)
        ctx = jnp.concatenate(ctx_heads, axis=-1)                 # (BS, H)

        attn = jnp.dot(ctx.astype(jnp.bfloat16), wo_ref[l],
                       preferred_element_type=jnp.float32) + bo_ref[l]     # (BS, H)
        x = _layernorm(attn + x, ln1g_ref[l], ln1b_ref[l])

        # FFN with exact (erf) GELU; elementwise math stays f32.
        h1 = _gelu_exact(jnp.dot(x.astype(jnp.bfloat16), w1_ref[l],
                                 preferred_element_type=jnp.float32) + b1_ref[l])
        h2 = jnp.dot(h1.astype(jnp.bfloat16), w2_ref[l],
                     preferred_element_type=jnp.float32) + b2_ref[l]
        x = _layernorm(h2 + x, ln2g_ref[l], ln2b_ref[l])

    # CLS scorer epilogue: pick each example's CLS row (row b*S of the folded
    # matrix), score = sum(cls * w) + b.  Single store of all B scores.
    cls_rows = jnp.concatenate([x[b * S:b * S + 1, :] for b in range(B)], axis=0)  # (B, H)
    score_ref[...] = (jnp.sum(cls_rows * sw_ref[...], axis=-1, keepdims=True)
                      + sb_ref[...])                              # (B, 1)


# ----------------------------- parameter init ---------------------------------
def init_params(key):
    def nrm(k, shape, dtype=jnp.float32):
        return (0.02 * jax.random.normal(k, shape, dtype=jnp.float32)).astype(dtype)

    ks = jax.random.split(key, 8)
    return {
        "tok_emb": nrm(ks[0], (VOCAB, H)),
        "pos_emb": nrm(ks[1], (S, H)),
        "type_emb": nrm(ks[2], (2, H)),
        "emb_ln_g": jnp.ones((1, H), jnp.float32),
        "emb_ln_b": jnp.zeros((1, H), jnp.float32),
        # Per-layer weights stacked on a leading layer axis; Q/K/V fused to
        # (H, 3H).  Matmul weights are bf16 (MXU-native); biases/LN stay f32.
        "wqkv": nrm(ks[3], (NLAYERS, H, 3 * H), jnp.bfloat16),
        "bqkv": jnp.zeros((NLAYERS, 1, 3 * H), jnp.float32),
        "wo": nrm(ks[4], (NLAYERS, H, H), jnp.bfloat16),
        "bo": jnp.zeros((NLAYERS, 1, H), jnp.float32),
        "ln1_g": jnp.ones((NLAYERS, 1, H), jnp.float32),
        "ln1_b": jnp.zeros((NLAYERS, 1, H), jnp.float32),
        "w1": nrm(ks[5], (NLAYERS, H, FFN), jnp.bfloat16),
        "b1": jnp.zeros((NLAYERS, 1, FFN), jnp.float32),
        "w2": nrm(ks[6], (NLAYERS, FFN, H), jnp.bfloat16),
        "b2": jnp.zeros((NLAYERS, 1, H), jnp.float32),
        "ln2_g": jnp.ones((NLAYERS, 1, H), jnp.float32),
        "ln2_b": jnp.zeros((NLAYERS, 1, H), jnp.float32),
        "score_w": nrm(ks[7], (1, H)),
        "score_b": jnp.zeros((1, 1), jnp.float32),
    }


# ----------------------------- forward pass ------------------------------------
def table_retrieval_forward(params, token_ids, token_type_ids, attention_mask):
    """Equivalent of: score = scorer(bert(ids).last_hidden_state[:, 0, :]).squeeze(1)."""
    # Embedding gathers stay in plain JAX (glue); everything downstream is one
    # fused, grid-less Pallas kernel over the folded (B*S, H) activations.
    pos = jnp.arange(S)
    emb = (params["tok_emb"][token_ids]
           + params["pos_emb"][pos][None, :, :]
           + params["type_emb"][token_type_ids])                    # (B, S, H)
    emb = emb.reshape(BS, H)

    # Block-diagonal additive attention bias over the folded axis:
    # 0 where (same example AND key not padded), -1e9 otherwise.
    seg = jnp.repeat(jnp.arange(B), S)                              # (BS,)
    key_ok = attention_mask.reshape(-1).astype(jnp.float32)         # (BS,)
    valid = (seg[:, None] == seg[None, :]).astype(jnp.float32) * key_ok[None, :]
    bias = (valid - 1.0) * 1e9                                      # (BS, BS)

    score = pl.pallas_call(
        _encoder_kernel,
        out_shape=jax.ShapeDtypeStruct((B, 1), jnp.float32),
        # No grid / no BlockSpecs: single invocation, whole arrays in VMEM.
    )(emb, bias, params["emb_ln_g"], params["emb_ln_b"],
      params["wqkv"], params["bqkv"], params["wo"], params["bo"],
      params["ln1_g"], params["ln1_b"],
      params["w1"], params["b1"], params["w2"], params["b2"],
      params["ln2_g"], params["ln2_b"],
      params["score_w"], params["score_b"])

    return score[:, 0]                                              # (B,)


# ----------------------------- main --------------------------------------------
if __name__ == "__main__":
    # TODO(synk): the HuggingFace string tokenizer (query/table text -> ids) and
    # pretrained BERT weight loading have no Pallas equivalent; synthetic integer
    # token ids and deterministic synthetic weights are used instead.
    key = jax.random.PRNGKey(0)
    pkey, dkey = jax.random.split(key)
    params = init_params(pkey)

    token_ids = jax.random.randint(dkey, (B, S), 0, VOCAB, dtype=jnp.int32)
    token_type_ids = jnp.concatenate(
        [jnp.zeros((B, S // 2), jnp.int32), jnp.ones((B, S - S // 2), jnp.int32)],
        axis=1)
    # example 0 fully valid, example 1 padded after 5 tokens
    attention_mask = jnp.array([[1] * S, [1] * 5 + [0] * (S - 5)], dtype=jnp.int32)

    scores = jax.jit(table_retrieval_forward)(params, token_ids, token_type_ids,
                                              attention_mask)
    jax.block_until_ready(scores)
    assert scores.shape == (B,) and scores.dtype == jnp.float32
    assert bool(jnp.all(jnp.isfinite(scores)))
    print("KERNEL_OK")
</pallas_src>

<mosaic_0001>
module attributes {stable_mosaic.version = 11 : i64} {
  func.func @_encoder_kernel(%arg0: memref<16x32xf32, #tpu.memory_space<vmem>>, %arg1: memref<16x16xf32, #tpu.memory_space<vmem>>, %arg2: memref<1x32xf32, #tpu.memory_space<vmem>>, %arg3: memref<1x32xf32, #tpu.memory_space<vmem>>, %arg4: memref<2x32x96xbf16, #tpu.memory_space<vmem>>, %arg5: memref<2x1x96xf32, #tpu.memory_space<vmem>>, %arg6: memref<2x32x32xbf16, #tpu.memory_space<vmem>>, %arg7: memref<2x1x32xf32, #tpu.memory_space<vmem>>, %arg8: memref<2x1x32xf32, #tpu.memory_space<vmem>>, %arg9: memref<2x1x32xf32, #tpu.memory_space<vmem>>, %arg10: memref<2x32x64xbf16, #tpu.memory_space<vmem>>, %arg11: memref<2x1x64xf32, #tpu.memory_space<vmem>>, %arg12: memref<2x64x32xbf16, #tpu.memory_space<vmem>>, %arg13: memref<2x1x32xf32, #tpu.memory_space<vmem>>, %arg14: memref<2x1x32xf32, #tpu.memory_space<vmem>>, %arg15: memref<2x1x32xf32, #tpu.memory_space<vmem>>, %arg16: memref<1x32xf32, #tpu.memory_space<vmem>>, %arg17: memref<1x1xf32, #tpu.memory_space<vmem>>, %arg18: memref<2x1xf32, #tpu.memory_space<vmem>>) attributes {dimension_semantics = [], scalar_prefetch = 0 : i64, scratch_operands = 0 : i64, tpu.core_type = #tpu.core_type<tc>} {
    %c0 = arith.constant 0 : index
    %c0_0 = arith.constant 0 : index
    %0 = vector.load %arg0[%c0, %c0_0] : memref<16x32xf32, #tpu.memory_space<vmem>>, vector<16x32xf32>
    %c0_1 = arith.constant 0 : index
    %c0_2 = arith.constant 0 : index
    %1 = vector.load %arg2[%c0_1, %c0_2] : memref<1x32xf32, #tpu.memory_space<vmem>>, vector<1x32xf32>
    %c0_3 = arith.constant 0 : index
    %c0_4 = arith.constant 0 : index
    %2 = vector.load %arg3[%c0_3, %c0_4] : memref<1x32xf32, #tpu.memory_space<vmem>>, vector<1x32xf32>
    %cst = arith.constant dense<0.000000e+00> : vector<16xf32>
    %3 = vector.multi_reduction <add>, %0, %cst [1] : vector<16x32xf32> to vector<16xf32>
    %4 = vector.shape_cast %3 : vector<16xf32> to vector<16x1xf32>
    %cst_5 = arith.constant 3.200000e+01 : f32
    %5 = vector.broadcast %cst_5 : f32 to vector<16x1xf32>
    %6 = arith.divf %4, %5 : vector<16x1xf32>
    %7 = vector.broadcast %6 : vector<16x1xf32> to vector<16x32xf32>
    %8 = arith.subf %0, %7 : vector<16x32xf32>
    %9 = arith.mulf %8, %8 : vector<16x32xf32>
    %cst_6 = arith.constant dense<0.000000e+00> : vector<16xf32>
    %10 = vector.multi_reduction <add>, %9, %cst_6 [1] : vector<16x32xf32> to vector<16xf32>
    %11 = vector.shape_cast %10 : vector<16xf32> to vector<16x1xf32>
    %cst_7 = arith.constant 3.200000e+01 : f32
    %12 = vector.broadcast %cst_7 : f32 to vector<16x1xf32>
    %13 = arith.divf %11, %12 : vector<16x1xf32>
    %cst_8 = arith.constant 9.99999996E-13 : f32
    %14 = vector.broadcast %cst_8 : f32 to vector<16x1xf32>
    %15 = arith.addf %13, %14 : vector<16x1xf32>
    %16 = math.rsqrt %15 : vector<16x1xf32>
    %17 = vector.broadcast %16 : vector<16x1xf32> to vector<16x32xf32>
    %18 = arith.mulf %8, %17 : vector<16x32xf32>
    %19 = vector.broadcast %1 : vector<1x32xf32> to vector<16x32xf32>
    %20 = arith.mulf %18, %19 : vector<16x32xf32>
    %21 = vector.broadcast %2 : vector<1x32xf32> to vector<16x32xf32>
    %22 = arith.addf %20, %21 : vector<16x32xf32>
    %c0_9 = arith.constant 0 : index
    %c0_10 = arith.constant 0 : index
    %23 = vector.load %arg1[%c0_9, %c0_10] : memref<16x16xf32, #tpu.memory_space<vmem>>, vector<16x16xf32>
    %24 = arith.truncf %22 : vector<16x32xf32> to vector<16x32xbf16>
    %c0_11 = arith.constant 0 : index
    %c0_12 = arith.constant 0 : index
    %c0_13 = arith.constant 0 : index
    %25 = vector.load %arg4[%c0_11, %c0_12, %c0_13] : memref<2x32x96xbf16, #tpu.memory_space<vmem>>, vector<1x32x96xbf16>
    %26 = vector.shape_cast %25 : vector<1x32x96xbf16> to vector<32x96xbf16>
    %cst_14 = arith.constant dense<0.000000e+00> : vector<16x96xf32>
    %27 = tpu.matmul %24, %26, %cst_14 {dimension_numbers = #tpu.dot_dimension_numbers<[1], [0], [0], [1], [0, 0, 1, 1], [], []>} : vector<16x32xbf16>, vector<32x96xbf16>, vector<16x96xf32> -> vector<16x96xf32>
    %c0_15 = arith.constant 0 : index
    %c0_16 = arith.constant 0 : index
    %c0_17 = arith.constant 0 : index
    %28 = vector.load %arg5[%c0_15, %c0_16, %c0_17] : memref<2x1x96xf32, #tpu.memory_space<vmem>>, vector<1x1x96xf32>
    %29 = vector.shape_cast %28 : vector<1x1x96xf32> to vector<1x96xf32>
    %30 = vector.broadcast %29 : vector<1x96xf32> to vector<16x96xf32>
    %31 = arith.addf %27, %30 : vector<16x96xf32>
    %32 = vector.extract_strided_slice %31 {offsets = [0, 0], sizes = [16, 16], strides = [1, 1]} : vector<16x96xf32> to vector<16x16xf32>
    %33 = vector.extract_strided_slice %31 {offsets = [0, 32], sizes = [16, 16], strides = [1, 1]} : vector<16x96xf32> to vector<16x16xf32>
    %34 = vector.extract_strided_slice %31 {offsets = [0, 64], sizes = [16, 16], strides = [1, 1]} : vector<16x96xf32> to vector<16x16xf32>
    %cst_18 = arith.constant dense<0.000000e+00> : vector<16x16xf32>
    %35 = tpu.matmul %32, %33, %cst_18 {dimension_numbers = #tpu.dot_dimension_numbers<[1], [1], [0], [0], [0, 0, 1, 0], [], []>} : vector<16x16xf32>, vector<16x16xf32>, vector<16x16xf32> -> vector<16x16xf32>
    %cst_19 = arith.constant 2.500000e-01 : f32
    %36 = vector.broadcast %cst_19 : f32 to vector<16x16xf32>
    %37 = arith.mulf %35, %36 : vector<16x16xf32>
    %38 = arith.addf %37, %23 : vector<16x16xf32>
    %cst_20 = arith.constant dense<0xFF800000> : vector<16xf32>
    %39 = vector.multi_reduction <maximumf>, %38, %cst_20 [1] : vector<16x16xf32> to vector<16xf32>
    %40 = vector.shape_cast %39 : vector<16xf32> to vector<16x1xf32>
    %41 = vector.broadcast %40 : vector<16x1xf32> to vector<16x16xf32>
    %42 = arith.subf %38, %41 : vector<16x16xf32>
    %43 = math.exp %42 : vector<16x16xf32>
    %cst_21 = arith.constant dense<0.000000e+00> : vector<16xf32>
    %44 = vector.multi_reduction <add>, %43, %cst_21 [1] : vector<16x16xf32> to vector<16xf32>
    %45 = vector.shape_cast %44 : vector<16xf32> to vector<16x1xf32>
    %46 = tpu.reciprocal %45 {approx = true} : vector<16x1xf32> -> vector<16x1xf32>
    %47 = vector.broadcast %46 : vector<16x1xf32> to vector<16x16xf32>
    %48 = arith.mulf %43, %47 : vector<16x16xf32>
    %cst_22 = arith.constant dense<0.000000e+00> : vector<16x16xf32>
    %49 = tpu.matmul %48, %34, %cst_22 {dimension_numbers = #tpu.dot_dimension_numbers<[1], [0], [0], [1], [0, 0, 1, 1], [], []>} : vector<16x16xf32>, vector<16x16xf32>, vector<16x16xf32> -> vector<16x16xf32>
    %50 = vector.extract_strided_slice %31 {offsets = [0, 16], sizes = [16, 16], strides = [1, 1]} : vector<16x96xf32> to vector<16x16xf32>
    %51 = vector.extract_strided_slice %31 {offsets = [0, 48], sizes = [16, 16], strides = [1, 1]} : vector<16x96xf32> to vector<16x16xf32>
    %52 = vector.extract_strided_slice %31 {offsets = [0, 80], sizes = [16, 16], strides = [1, 1]} : vector<16x96xf32> to vector<16x16xf32>
    %cst_23 = arith.constant dense<0.000000e+00> : vector<16x16xf32>
    %53 = tpu.matmul %50, %51, %cst_23 {dimension_numbers = #tpu.dot_dimension_numbers<[1], [1], [0], [0], [0, 0, 1, 0], [], []>} : vector<16x16xf32>, vector<16x16xf32>, vector<16x16xf32> -> vector<16x16xf32>
    %cst_24 = arith.constant 2.500000e-01 : f32
    %54 = vector.broadcast %cst_24 : f32 to vector<16x16xf32>
    %55 = arith.mulf %53, %54 : vector<16x16xf32>
    %56 = arith.addf %55, %23 : vector<16x16xf32>
    %cst_25 = arith.constant dense<0xFF800000> : vector<16xf32>
    %57 = vector.multi_reduction <maximumf>, %56, %cst_25 [1] : vector<16x16xf32> to vector<16xf32>
    %58 = vector.shape_cast %57 : vector<16xf32> to vector<16x1xf32>
    %59 = vector.broadcast %58 : vector<16x1xf32> to vector<16x16xf32>
    %60 = arith.subf %56, %59 : vector<16x16xf32>
    %61 = math.exp %60 : vector<16x16xf32>
    %cst_26 = arith.constant dense<0.000000e+00> : vector<16xf32>
    %62 = vector.multi_reduction <add>, %61, %cst_26 [1] : vector<16x16xf32> to vector<16xf32>
    %63 = vector.shape_cast %62 : vector<16xf32> to vector<16x1xf32>
    %64 = tpu.reciprocal %63 {approx = true} : vector<16x1xf32> -> vector<16x1xf32>
    %65 = vector.broadcast %64 : vector<16x1xf32> to vector<16x16xf32>
    %66 = arith.mulf %61, %65 : vector<16x16xf32>
    %cst_27 = arith.constant dense<0.000000e+00> : vector<16x16xf32>
    %67 = tpu.matmul %66, %52, %cst_27 {dimension_numbers = #tpu.dot_dimension_numbers<[1], [0], [0], [1], [0, 0, 1, 1], [], []>} : vector<16x16xf32>, vector<16x16xf32>, vector<16x16xf32> -> vector<16x16xf32>
    %68 = tpu.concatenate %49, %67 in 1 : vector<16x16xf32>, vector<16x16xf32> -> vector<16x32xf32>
    %69 = arith.truncf %68 : vector<16x32xf32> to vector<16x32xbf16>
    %c0_28 = arith.constant 0 : index
    %c0_29 = arith.constant 0 : index
    %c0_30 = arith.constant 0 : index
    %70 = vector.load %arg6[%c0_28, %c0_29, %c0_30] : memref<2x32x32xbf16, #tpu.memory_space<vmem>>, vector<1x32x32xbf16>
    %71 = vector.shape_cast %70 : vector<1x32x32xbf16> to vector<32x32xbf16>
    %cst_31 = arith.constant dense<0.000000e+00> : vector<16x32xf32>
    %72 = tpu.matmul %69, %71, %cst_31 {dimension_numbers = #tpu.dot_dimension_numbers<[1], [0], [0], [1], [0, 0, 1, 1], [], []>} : vector<16x32xbf16>, vector<32x32xbf16>, vector<16x32xf32> -> vector<16x32xf32>
    %c0_32 = arith.constant 0 : index
    %c0_33 = arith.constant 0 : index
    %c0_34 = arith.constant 0 : index
    %73 = vector.load %arg7[%c0_32, %c0_33, %c0_34] : memref<2x1x32xf32, #tpu.memory_space<vmem>>, vector<1x1x32xf32>
    %74 = vector.shape_cast %73 : vector<1x1x32xf32> to vector<1x32xf32>
    %75 = vector.broadcast %74 : vector<1x32xf32> to vector<16x32xf32>
    %76 = arith.addf %72, %75 : vector<16x32xf32>
    %77 = arith.addf %76, %22 : vector<16x32xf32>
    %c0_35 = arith.constant 0 : index
    %c0_36 = arith.constant 0 : index
    %c0_37 = arith.constant 0 : index
    %78 = vector.load %arg8[%c0_35, %c0_36, %c0_37] : memref<2x1x32xf32, #tpu.memory_space<vmem>>, vector<1x1x32xf32>
    %79 = vector.shape_cast %78 : vector<1x1x32xf32> to vector<1x32xf32>
    %c0_38 = arith.constant 0 : index
    %c0_39 = arith.constant 0 : index
    %c0_40 = arith.constant 0 : index
    %80 = vector.load %arg9[%c0_38, %c0_39, %c0_40] : memref<2x1x32xf32, #tpu.memory_space<vmem>>, vector<1x1x32xf32>
    %81 = vector.shape_cast %80 : vector<1x1x32xf32> to vector<1x32xf32>
    %cst_41 = arith.constant dense<0.000000e+00> : vector<16xf32>
    %82 = vector.multi_reduction <add>, %77, %cst_41 [1] : vector<16x32xf32> to vector<16xf32>
    %83 = vector.shape_cast %82 : vector<16xf32> to vector<16x1xf32>
    %cst_42 = arith.constant 3.200000e+01 : f32
    %84 = vector.broadcast %cst_42 : f32 to vector<16x1xf32>
    %85 = arith.divf %83, %84 : vector<16x1xf32>
    %86 = vector.broadcast %85 : vector<16x1xf32> to vector<16x32xf32>
    %87 = arith.subf %77, %86 : vector<16x32xf32>
    %88 = arith.mulf %87, %87 : vector<16x32xf32>
    %cst_43 = arith.constant dense<0.000000e+00> : vector<16xf32>
    %89 = vector.multi_reduction <add>, %88, %cst_43 [1] : vector<16x32xf32> to vector<16xf32>
    %90 = vector.shape_cast %89 : vector<16xf32> to vector<16x1xf32>
    %cst_44 = arith.constant 3.200000e+01 : f32
    %91 = vector.broadcast %cst_44 : f32 to vector<16x1xf32>
    %92 = arith.divf %90, %91 : vector<16x1xf32>
    %cst_45 = arith.constant 9.99999996E-13 : f32
    %93 = vector.broadcast %cst_45 : f32 to vector<16x1xf32>
    %94 = arith.addf %92, %93 : vector<16x1xf32>
    %95 = math.rsqrt %94 : vector<16x1xf32>
    %96 = vector.broadcast %95 : vector<16x1xf32> to vector<16x32xf32>
    %97 = arith.mulf %87, %96 : vector<16x32xf32>
    %98 = vector.broadcast %79 : vector<1x32xf32> to vector<16x32xf32>
    %99 = arith.mulf %97, %98 : vector<16x32xf32>
    %100 = vector.broadcast %81 : vector<1x32xf32> to vector<16x32xf32>
    %101 = arith.addf %99, %100 : vector<16x32xf32>
    %102 = arith.truncf %101 : vector<16x32xf32> to vector<16x32xbf16>
    %c0_46 = arith.constant 0 : index
    %c0_47 = arith.constant 0 : index
    %c0_48 = arith.constant 0 : index
    %103 = vector.load %arg10[%c0_46, %c0_47, %c0_48] : memref<2x32x64xbf16, #tpu.memory_space<vmem>>, vector<1x32x64xbf16>
    %104 = vector.shape_cast %103 : vector<1x32x64xbf16> to vector<32x64xbf16>
    %cst_49 = arith.constant dense<0.000000e+00> : vector<16x64xf32>
    %105 = tpu.matmul %102, %104, %cst_49 {dimension_numbers = #tpu.dot_dimension_numbers<[1], [0], [0], [1], [0, 0, 1, 1], [], []>} : vector<16x32xbf16>, vector<32x64xbf16>, vector<16x64xf32> -> vector<16x64xf32>
    %c0_50 = arith.constant 0 : index
    %c0_51 = arith.constant 0 : index
    %c0_52 = arith.constant 0 : index
    %106 = vector.load %arg11[%c0_50, %c0_51, %c0_52] : memref<2x1x64xf32, #tpu.memory_space<vmem>>, vector<1x1x64xf32>
    %107 = vector.shape_cast %106 : vector<1x1x64xf32> to vector<1x64xf32>
    %108 = vector.broadcast %107 : vector<1x64xf32> to vector<16x64xf32>
    %109 = arith.addf %105, %108 : vector<16x64xf32>
    %cst_53 = arith.constant 5.000000e-01 : f32
    %110 = vector.broadcast %cst_53 : f32 to vector<16x64xf32>
    %111 = arith.mulf %110, %109 : vector<16x64xf32>
    %cst_54 = arith.constant 0.707106769 : f32
    %112 = vector.broadcast %cst_54 : f32 to vector<16x64xf32>
    %113 = arith.mulf %109, %112 : vector<16x64xf32>
    %cst_55 = arith.constant 0.000000e+00 : f32
    %114 = vector.broadcast %cst_55 : f32 to vector<16x64xf32>
    %115 = arith.cmpf olt, %113, %114 : vector<16x64xf32>
    %cst_56 = arith.constant -1.000000e+00 : f32
    %cst_57 = arith.constant 1.000000e+00 : f32
    %116 = vector.broadcast %cst_56 : f32 to vector<16x64xf32>
    %117 = vector.broadcast %cst_57 : f32 to vector<16x64xf32>
    %118 = arith.select %115, %116, %117 : vector<16x64xi1>, vector<16x64xf32>
    %119 = arith.mulf %113, %118 : vector<16x64xf32>
    %cst_58 = arith.constant 0.327591091 : f32
    %120 = vector.broadcast %cst_58 : f32 to vector<16x64xf32>
    %121 = arith.mulf %120, %119 : vector<16x64xf32>
    %cst_59 = arith.constant 1.000000e+00 : f32
    %122 = vector.broadcast %cst_59 : f32 to vector<16x64xf32>
    %123 = arith.addf %122, %121 : vector<16x64xf32>
    %124 = tpu.reciprocal %123 {approx = true} : vector<16x64xf32> -> vector<16x64xf32>
    %cst_60 = arith.constant 1.06140542 : f32
    %125 = vector.broadcast %cst_60 : f32 to vector<16x64xf32>
    %126 = arith.mulf %125, %124 : vector<16x64xf32>
    %cst_61 = arith.constant -1.45315206 : f32
    %127 = vector.broadcast %cst_61 : f32 to vector<16x64xf32>
    %128 = arith.addf %126, %127 : vector<16x64xf32>
    %129 = arith.mulf %128, %124 : vector<16x64xf32>
    %cst_62 = arith.constant 1.42141378 : f32
    %130 = vector.broadcast %cst_62 : f32 to vector<16x64xf32>
    %131 = arith.addf %129, %130 : vector<16x64xf32>
    %132 = arith.mulf %131, %124 : vector<16x64xf32>
    %cst_63 = arith.constant -0.284496725 : f32
    %133 = vector.broadcast %cst_63 : f32 to vector<16x64xf32>
    %134 = arith.addf %132, %133 : vector<16x64xf32>
    %135 = arith.mulf %134, %124 : vector<16x64xf32>
    %cst_64 = arith.constant 0.254829586 : f32
    %136 = vector.broadcast %cst_64 : f32 to vector<16x64xf32>
    %137 = arith.addf %135, %136 : vector<16x64xf32>
    %138 = arith.mulf %137, %124 : vector<16x64xf32>
    %cst_65 = arith.constant 0.000000e+00 : f32
    %139 = vector.broadcast %cst_65 : f32 to vector<16x64xf32>
    %140 = arith.subf %139, %119 : vector<16x64xf32>
    %141 = arith.mulf %140, %119 : vector<16x64xf32>
    %142 = math.exp %141 : vector<16x64xf32>
    %143 = arith.mulf %138, %142 : vector<16x64xf32>
    %cst_66 = arith.constant 1.000000e+00 : f32
    %144 = vector.broadcast %cst_66 : f32 to vector<16x64xf32>
    %145 = arith.subf %144, %143 : vector<16x64xf32>
    %146 = arith.mulf %118, %145 : vector<16x64xf32>
    %cst_67 = arith.constant 1.000000e+00 : f32
    %147 = vector.broadcast %cst_67 : f32 to vector<16x64xf32>
    %148 = arith.addf %147, %146 : vector<16x64xf32>
    %149 = arith.mulf %111, %148 : vector<16x64xf32>
    %150 = arith.truncf %149 : vector<16x64xf32> to vector<16x64xbf16>
    %c0_68 = arith.constant 0 : index
    %c0_69 = arith.constant 0 : index
    %c0_70 = arith.constant 0 : index
    %151 = vector.load %arg12[%c0_68, %c0_69, %c0_70] : memref<2x64x32xbf16, #tpu.memory_space<vmem>>, vector<1x64x32xbf16>
    %152 = vector.shape_cast %151 : vector<1x64x32xbf16> to vector<64x32xbf16>
    %cst_71 = arith.constant dense<0.000000e+00> : vector<16x32xf32>
    %153 = tpu.matmul %150, %152, %cst_71 {dimension_numbers = #tpu.dot_dimension_numbers<[1], [0], [0], [1], [0, 0, 1, 1], [], []>} : vector<16x64xbf16>, vector<64x32xbf16>, vector<16x32xf32> -> vector<16x32xf32>
    %c0_72 = arith.constant 0 : index
    %c0_73 = arith.constant 0 : index
    %c0_74 = arith.constant 0 : index
    %154 = vector.load %arg13[%c0_72, %c0_73, %c0_74] : memref<2x1x32xf32, #tpu.memory_space<vmem>>, vector<1x1x32xf32>
    %155 = vector.shape_cast %154 : vector<1x1x32xf32> to vector<1x32xf32>
    %156 = vector.broadcast %155 : vector<1x32xf32> to vector<16x32xf32>
    %157 = arith.addf %153, %156 : vector<16x32xf32>
    %158 = arith.addf %157, %101 : vector<16x32xf32>
    %c0_75 = arith.constant 0 : index
    %c0_76 = arith.constant 0 : index
    %c0_77 = arith.constant 0 : index
    %159 = vector.load %arg14[%c0_75, %c0_76, %c0_77] : memref<2x1x32xf32, #tpu.memory_space<vmem>>, vector<1x1x32xf32>
    %160 = vector.shape_cast %159 : vector<1x1x32xf32> to vector<1x32xf32>
    %c0_78 = arith.constant 0 : index
    %c0_79 = arith.constant 0 : index
    %c0_80 = arith.constant 0 : index
    %161 = vector.load %arg15[%c0_78, %c0_79, %c0_80] : memref<2x1x32xf32, #tpu.memory_space<vmem>>, vector<1x1x32xf32>
    %162 = vector.shape_cast %161 : vector<1x1x32xf32> to vector<1x32xf32>
    %cst_81 = arith.constant dense<0.000000e+00> : vector<16xf32>
    %163 = vector.multi_reduction <add>, %158, %cst_81 [1] : vector<16x32xf32> to vector<16xf32>
    %164 = vector.shape_cast %163 : vector<16xf32> to vector<16x1xf32>
    %cst_82 = arith.constant 3.200000e+01 : f32
    %165 = vector.broadcast %cst_82 : f32 to vector<16x1xf32>
    %166 = arith.divf %164, %165 : vector<16x1xf32>
    %167 = vector.broadcast %166 : vector<16x1xf32> to vector<16x32xf32>
    %168 = arith.subf %158, %167 : vector<16x32xf32>
    %169 = arith.mulf %168, %168 : vector<16x32xf32>
    %cst_83 = arith.constant dense<0.000000e+00> : vector<16xf32>
    %170 = vector.multi_reduction <add>, %169, %cst_83 [1] : vector<16x32xf32> to vector<16xf32>
    %171 = vector.shape_cast %170 : vector<16xf32> to vector<16x1xf32>
    %cst_84 = arith.constant 3.200000e+01 : f32
    %172 = vector.broadcast %cst_84 : f32 to vector<16x1xf32>
    %173 = arith.divf %171, %172 : vector<16x1xf32>
    %cst_85 = arith.constant 9.99999996E-13 : f32
    %174 = vector.broadcast %cst_85 : f32 to vector<16x1xf32>
    %175 = arith.addf %173, %174 : vector<16x1xf32>
    %176 = math.rsqrt %175 : vector<16x1xf32>
    %177 = vector.broadcast %176 : vector<16x1xf32> to vector<16x32xf32>
    %178 = arith.mulf %168, %177 : vector<16x32xf32>
    %179 = vector.broadcast %160 : vector<1x32xf32> to vector<16x32xf32>
    %180 = arith.mulf %178, %179 : vector<16x32xf32>
    %181 = vector.broadcast %162 : vector<1x32xf32> to vector<16x32xf32>
    %182 = arith.addf %180, %181 : vector<16x32xf32>
    %183 = arith.truncf %182 : vector<16x32xf32> to vector<16x32xbf16>
    %c1 = arith.constant 1 : index
    %c0_86 = arith.constant 0 : index
    %c0_87 = arith.constant 0 : index
    %184 = vector.load %arg4[%c1, %c0_86, %c0_87] : memref<2x32x96xbf16, #tpu.memory_space<vmem>>, vector<1x32x96xbf16>
    %185 = vector.shape_cast %184 : vector<1x32x96xbf16> to vector<32x96xbf16>
    %cst_88 = arith.constant dense<0.000000e+00> : vector<16x96xf32>
    %186 = tpu.matmul %183, %185, %cst_88 {dimension_numbers = #tpu.dot_dimension_numbers<[1], [0], [0], [1], [0, 0, 1, 1], [], []>} : vector<16x32xbf16>, vector<32x96xbf16>, vector<16x96xf32> -> vector<16x96xf32>
    %c1_89 = arith.constant 1 : index
    %c0_90 = arith.constant 0 : index
    %c0_91 = arith.constant 0 : index
    %187 = vector.load %arg5[%c1_89, %c0_90, %c0_91] : memref<2x1x96xf32, #tpu.memory_space<vmem>>, vector<1x1x96xf32>
    %188 = vector.shape_cast %187 : vector<1x1x96xf32> to vector<1x96xf32>
    %189 = vector.broadcast %188 : vector<1x96xf32> to vector<16x96xf32>
    %190 = arith.addf %186, %189 : vector<16x96xf32>
    %191 = vector.extract_strided_slice %190 {offsets = [0, 0], sizes = [16, 16], strides = [1, 1]} : vector<16x96xf32> to vector<16x16xf32>
    %192 = vector.extract_strided_slice %190 {offsets = [0, 32], sizes = [16, 16], strides = [1, 1]} : vector<16x96xf32> to vector<16x16xf32>
    %193 = vector.extract_strided_slice %190 {offsets = [0, 64], sizes = [16, 16], strides = [1, 1]} : vector<16x96xf32> to vector<16x16xf32>
    %cst_92 = arith.constant dense<0.000000e+00> : vector<16x16xf32>
    %194 = tpu.matmul %191, %192, %cst_92 {dimension_numbers = #tpu.dot_dimension_numbers<[1], [1], [0], [0], [0, 0, 1, 0], [], []>} : vector<16x16xf32>, vector<16x16xf32>, vector<16x16xf32> -> vector<16x16xf32>
    %cst_93 = arith.constant 2.500000e-01 : f32
    %195 = vector.broadcast %cst_93 : f32 to vector<16x16xf32>
    %196 = arith.mulf %194, %195 : vector<16x16xf32>
    %197 = arith.addf %196, %23 : vector<16x16xf32>
    %cst_94 = arith.constant dense<0xFF800000> : vector<16xf32>
    %198 = vector.multi_reduction <maximumf>, %197, %cst_94 [1] : vector<16x16xf32> to vector<16xf32>
    %199 = vector.shape_cast %198 : vector<16xf32> to vector<16x1xf32>
    %200 = vector.broadcast %199 : vector<16x1xf32> to vector<16x16xf32>
    %201 = arith.subf %197, %200 : vector<16x16xf32>
    %202 = math.exp %201 : vector<16x16xf32>
    %cst_95 = arith.constant dense<0.000000e+00> : vector<16xf32>
    %203 = vector.multi_reduction <add>, %202, %cst_95 [1] : vector<16x16xf32> to vector<16xf32>
    %204 = vector.shape_cast %203 : vector<16xf32> to vector<16x1xf32>
    %205 = tpu.reciprocal %204 {approx = true} : vector<16x1xf32> -> vector<16x1xf32>
    %206 = vector.broadcast %205 : vector<16x1xf32> to vector<16x16xf32>
    %207 = arith.mulf %202, %206 : vector<16x16xf32>
    %cst_96 = arith.constant dense<0.000000e+00> : vector<16x16xf32>
    %208 = tpu.matmul %207, %193, %cst_96 {dimension_numbers = #tpu.dot_dimension_numbers<[1], [0], [0], [1], [0, 0, 1, 1], [], []>} : vector<16x16xf32>, vector<16x16xf32>, vector<16x16xf32> -> vector<16x16xf32>
    %209 = vector.extract_strided_slice %190 {offsets = [0, 16], sizes = [16, 16], strides = [1, 1]} : vector<16x96xf32> to vector<16x16xf32>
    %210 = vector.extract_strided_slice %190 {offsets = [0, 48], sizes = [16, 16], strides = [1, 1]} : vector<16x96xf32> to vector<16x16xf32>
    %211 = vector.extract_strided_slice %190 {offsets = [0, 80], sizes = [16, 16], strides = [1, 1]} : vector<16x96xf32> to vector<16x16xf32>
    %cst_97 = arith.constant dense<0.000000e+00> : vector<16x16xf32>
    %212 = tpu.matmul %209, %210, %cst_97 {dimension_numbers = #tpu.dot_dimension_numbers<[1], [1], [0], [0], [0, 0, 1, 0], [], []>} : vector<16x16xf32>, vector<16x16xf32>, vector<16x16xf32> -> vector<16x16xf32>
    %cst_98 = arith.constant 2.500000e-01 : f32
    %213 = vector.broadcast %cst_98 : f32 to vector<16x16xf32>
    %214 = arith.mulf %212, %213 : vector<16x16xf32>
    %215 = arith.addf %214, %23 : vector<16x16xf32>
    %cst_99 = arith.constant dense<0xFF800000> : vector<16xf32>
    %216 = vector.multi_reduction <maximumf>, %215, %cst_99 [1] : vector<16x16xf32> to vector<16xf32>
    %217 = vector.shape_cast %216 : vector<16xf32> to vector<16x1xf32>
    %218 = vector.broadcast %217 : vector<16x1xf32> to vector<16x16xf32>
    %219 = arith.subf %215, %218 : vector<16x16xf32>
    %220 = math.exp %219 : vector<16x16xf32>
    %cst_100 = arith.constant dense<0.000000e+00> : vector<16xf32>
    %221 = vector.multi_reduction <add>, %220, %cst_100 [1] : vector<16x16xf32> to vector<16xf32>
    %222 = vector.shape_cast %221 : vector<16xf32> to vector<16x1xf32>
    %223 = tpu.reciprocal %222 {approx = true} : vector<16x1xf32> -> vector<16x1xf32>
    %224 = vector.broadcast %223 : vector<16x1xf32> to vector<16x16xf32>
    %225 = arith.mulf %220, %224 : vector<16x16xf32>
    %cst_101 = arith.constant dense<0.000000e+00> : vector<16x16xf32>
    %226 = tpu.matmul %225, %211, %cst_101 {dimension_numbers = #tpu.dot_dimension_numbers<[1], [0], [0], [1], [0, 0, 1, 1], [], []>} : vector<16x16xf32>, vector<16x16xf32>, vector<16x16xf32> -> vector<16x16xf32>
    %227 = tpu.concatenate %208, %226 in 1 : vector<16x16xf32>, vector<16x16xf32> -> vector<16x32xf32>
    %228 = arith.truncf %227 : vector<16x32xf32> to vector<16x32xbf16>
    %c1_102 = arith.constant 1 : index
    %c0_103 = arith.constant 0 : index
    %c0_104 = arith.constant 0 : index
    %229 = vector.load %arg6[%c1_102, %c0_103, %c0_104] : memref<2x32x32xbf16, #tpu.memory_space<vmem>>, vector<1x32x32xbf16>
    %230 = vector.shape_cast %229 : vector<1x32x32xbf16> to vector<32x32xbf16>
    %cst_105 = arith.constant dense<0.000000e+00> : vector<16x32xf32>
    %231 = tpu.matmul %228, %230, %cst_105 {dimension_numbers = #tpu.dot_dimension_numbers<[1], [0], [0], [1], [0, 0, 1, 1], [], []>} : vector<16x32xbf16>, vector<32x32xbf16>, vector<16x32xf32> -> vector<16x32xf32>
    %c1_106 = arith.constant 1 : index
    %c0_107 = arith.constant 0 : index
    %c0_108 = arith.constant 0 : index
    %232 = vector.load %arg7[%c1_106, %c0_107, %c0_108] : memref<2x1x32xf32, #tpu.memory_space<vmem>>, vector<1x1x32xf32>
    %233 = vector.shape_cast %232 : vector<1x1x32xf32> to vector<1x32xf32>
    %234 = vector.broadcast %233 : vector<1x32xf32> to vector<16x32xf32>
    %235 = arith.addf %231, %234 : vector<16x32xf32>
    %236 = arith.addf %235, %182 : vector<16x32xf32>
    %c1_109 = arith.constant 1 : index
    %c0_110 = arith.constant 0 : index
    %c0_111 = arith.constant 0 : index
    %237 = vector.load %arg8[%c1_109, %c0_110, %c0_111] : memref<2x1x32xf32, #tpu.memory_space<vmem>>, vector<1x1x32xf32>
    %238 = vector.shape_cast %237 : vector<1x1x32xf32> to vector<1x32xf32>
    %c1_112 = arith.constant 1 : index
    %c0_113 = arith.constant 0 : index
    %c0_114 = arith.constant 0 : index
    %239 = vector.load %arg9[%c1_112, %c0_113, %c0_114] : memref<2x1x32xf32, #tpu.memory_space<vmem>>, vector<1x1x32xf32>
    %240 = vector.shape_cast %239 : vector<1x1x32xf32> to vector<1x32xf32>
    %cst_115 = arith.constant dense<0.000000e+00> : vector<16xf32>
    %241 = vector.multi_reduction <add>, %236, %cst_115 [1] : vector<16x32xf32> to vector<16xf32>
    %242 = vector.shape_cast %241 : vector<16xf32> to vector<16x1xf32>
    %cst_116 = arith.constant 3.200000e+01 : f32
    %243 = vector.broadcast %cst_116 : f32 to vector<16x1xf32>
    %244 = arith.divf %242, %243 : vector<16x1xf32>
    %245 = vector.broadcast %244 : vector<16x1xf32> to vector<16x32xf32>
    %246 = arith.subf %236, %245 : vector<16x32xf32>
    %247 = arith.mulf %246, %246 : vector<16x32xf32>
    %cst_117 = arith.constant dense<0.000000e+00> : vector<16xf32>
    %248 = vector.multi_reduction <add>, %247, %cst_117 [1] : vector<16x32xf32> to vector<16xf32>
    %249 = vector.shape_cast %248 : vector<16xf32> to vector<16x1xf32>
    %cst_118 = arith.constant 3.200000e+01 : f32
    %250 = vector.broadcast %cst_118 : f32 to vector<16x1xf32>
    %251 = arith.divf %249, %250 : vector<16x1xf32>
    %cst_119 = arith.constant 9.99999996E-13 : f32
    %252 = vector.broadcast %cst_119 : f32 to vector<16x1xf32>
    %253 = arith.addf %251, %252 : vector<16x1xf32>
    %254 = math.rsqrt %253 : vector<16x1xf32>
    %255 = vector.broadcast %254 : vector<16x1xf32> to vector<16x32xf32>
    %256 = arith.mulf %246, %255 : vector<16x32xf32>
    %257 = vector.broadcast %238 : vector<1x32xf32> to vector<16x32xf32>
    %258 = arith.mulf %256, %257 : vector<16x32xf32>
    %259 = vector.broadcast %240 : vector<1x32xf32> to vector<16x32xf32>
    %260 = arith.addf %258, %259 : vector<16x32xf32>
    %261 = arith.truncf %260 : vector<16x32xf32> to vector<16x32xbf16>
    %c1_120 = arith.constant 1 : index
    %c0_121 = arith.constant 0 : index
    %c0_122 = arith.constant 0 : index
    %262 = vector.load %arg10[%c1_120, %c0_121, %c0_122] : memref<2x32x64xbf16, #tpu.memory_space<vmem>>, vector<1x32x64xbf16>
    %263 = vector.shape_cast %262 : vector<1x32x64xbf16> to vector<32x64xbf16>
    %cst_123 = arith.constant dense<0.000000e+00> : vector<16x64xf32>
    %264 = tpu.matmul %261, %263, %cst_123 {dimension_numbers = #tpu.dot_dimension_numbers<[1], [0], [0], [1], [0, 0, 1, 1], [], []>} : vector<16x32xbf16>, vector<32x64xbf16>, vector<16x64xf32> -> vector<16x64xf32>
    %c1_124 = arith.constant 1 : index
    %c0_125 = arith.constant 0 : index
    %c0_126 = arith.constant 0 : index
    %265 = vector.load %arg11[%c1_124, %c0_125, %c0_126] : memref<2x1x64xf32, #tpu.memory_space<vmem>>, vector<1x1x64xf32>
    %266 = vector.shape_cast %265 : vector<1x1x64xf32> to vector<1x64xf32>
    %267 = vector.broadcast %266 : vector<1x64xf32> to vector<16x64xf32>
    %268 = arith.addf %264, %267 : vector<16x64xf32>
    %cst_127 = arith.constant 5.000000e-01 : f32
    %269 = vector.broadcast %cst_127 : f32 to vector<16x64xf32>
    %270 = arith.mulf %269, %268 : vector<16x64xf32>
    %cst_128 = arith.constant 0.707106769 : f32
    %271 = vector.broadcast %cst_128 : f32 to vector<16x64xf32>
    %272 = arith.mulf %268, %271 : vector<16x64xf32>
    %cst_129 = arith.constant 0.000000e+00 : f32
    %273 = vector.broadcast %cst_129 : f32 to vector<16x64xf32>
    %274 = arith.cmpf olt, %272, %273 : vector<16x64xf32>
    %cst_130 = arith.constant -1.000000e+00 : f32
    %cst_131 = arith.constant 1.000000e+00 : f32
    %275 = vector.broadcast %cst_130 : f32 to vector<16x64xf32>
    %276 = vector.broadcast %cst_131 : f32 to vector<16x64xf32>
    %277 = arith.select %274, %275, %276 : vector<16x64xi1>, vector<16x64xf32>
    %278 = arith.mulf %272, %277 : vector<16x64xf32>
    %cst_132 = arith.constant 0.327591091 : f32
    %279 = vector.broadcast %cst_132 : f32 to vector<16x64xf32>
    %280 = arith.mulf %279, %278 : vector<16x64xf32>
    %cst_133 = arith.constant 1.000000e+00 : f32
    %281 = vector.broadcast %cst_133 : f32 to vector<16x64xf32>
    %282 = arith.addf %281, %280 : vector<16x64xf32>
    %283 = tpu.reciprocal %282 {approx = true} : vector<16x64xf32> -> vector<16x64xf32>
    %cst_134 = arith.constant 1.06140542 : f32
    %284 = vector.broadcast %cst_134 : f32 to vector<16x64xf32>
    %285 = arith.mulf %284, %283 : vector<16x64xf32>
    %cst_135 = arith.constant -1.45315206 : f32
    %286 = vector.broadcast %cst_135 : f32 to vector<16x64xf32>
    %287 = arith.addf %285, %286 : vector<16x64xf32>
    %288 = arith.mulf %287, %283 : vector<16x64xf32>
    %cst_136 = arith.constant 1.42141378 : f32
    %289 = vector.broadcast %cst_136 : f32 to vector<16x64xf32>
    %290 = arith.addf %288, %289 : vector<16x64xf32>
    %291 = arith.mulf %290, %283 : vector<16x64xf32>
    %cst_137 = arith.constant -0.284496725 : f32
    %292 = vector.broadcast %cst_137 : f32 to vector<16x64xf32>
    %293 = arith.addf %291, %292 : vector<16x64xf32>
    %294 = arith.mulf %293, %283 : vector<16x64xf32>
    %cst_138 = arith.constant 0.254829586 : f32
    %295 = vector.broadcast %cst_138 : f32 to vector<16x64xf32>
    %296 = arith.addf %294, %295 : vector<16x64xf32>
    %297 = arith.mulf %296, %283 : vector<16x64xf32>
    %cst_139 = arith.constant 0.000000e+00 : f32
    %298 = vector.broadcast %cst_139 : f32 to vector<16x64xf32>
    %299 = arith.subf %298, %278 : vector<16x64xf32>
    %300 = arith.mulf %299, %278 : vector<16x64xf32>
    %301 = math.exp %300 : vector<16x64xf32>
    %302 = arith.mulf %297, %301 : vector<16x64xf32>
    %cst_140 = arith.constant 1.000000e+00 : f32
    %303 = vector.broadcast %cst_140 : f32 to vector<16x64xf32>
    %304 = arith.subf %303, %302 : vector<16x64xf32>
    %305 = arith.mulf %277, %304 : vector<16x64xf32>
    %cst_141 = arith.constant 1.000000e+00 : f32
    %306 = vector.broadcast %cst_141 : f32 to vector<16x64xf32>
    %307 = arith.addf %306, %305 : vector<16x64xf32>
    %308 = arith.mulf %270, %307 : vector<16x64xf32>
    %309 = arith.truncf %308 : vector<16x64xf32> to vector<16x64xbf16>
    %c1_142 = arith.constant 1 : index
    %c0_143 = arith.constant 0 : index
    %c0_144 = arith.constant 0 : index
    %310 = vector.load %arg12[%c1_142, %c0_143, %c0_144] : memref<2x64x32xbf16, #tpu.memory_space<vmem>>, vector<1x64x32xbf16>
    %311 = vector.shape_cast %310 : vector<1x64x32xbf16> to vector<64x32xbf16>
    %cst_145 = arith.constant dense<0.000000e+00> : vector<16x32xf32>
    %312 = tpu.matmul %309, %311, %cst_145 {dimension_numbers = #tpu.dot_dimension_numbers<[1], [0], [0], [1], [0, 0, 1, 1], [], []>} : vector<16x64xbf16>, vector<64x32xbf16>, vector<16x32xf32> -> vector<16x32xf32>
    %c1_146 = arith.constant 1 : index
    %c0_147 = arith.constant 0 : index
    %c0_148 = arith.constant 0 : index
    %313 = vector.load %arg13[%c1_146, %c0_147, %c0_148] : memref<2x1x32xf32, #tpu.memory_space<vmem>>, vector<1x1x32xf32>
    %314 = vector.shape_cast %313 : vector<1x1x32xf32> to vector<1x32xf32>
    %315 = vector.broadcast %314 : vector<1x32xf32> to vector<16x32xf32>
    %316 = arith.addf %312, %315 : vector<16x32xf32>
    %317 = arith.addf %316, %260 : vector<16x32xf32>
    %c1_149 = arith.constant 1 : index
    %c0_150 = arith.constant 0 : index
    %c0_151 = arith.constant 0 : index
    %318 = vector.load %arg14[%c1_149, %c0_150, %c0_151] : memref<2x1x32xf32, #tpu.memory_space<vmem>>, vector<1x1x32xf32>
    %319 = vector.shape_cast %318 : vector<1x1x32xf32> to vector<1x32xf32>
    %c1_152 = arith.constant 1 : index
    %c0_153 = arith.constant 0 : index
    %c0_154 = arith.constant 0 : index
    %320 = vector.load %arg15[%c1_152, %c0_153, %c0_154] : memref<2x1x32xf32, #tpu.memory_space<vmem>>, vector<1x1x32xf32>
    %321 = vector.shape_cast %320 : vector<1x1x32xf32> to vector<1x32xf32>
    %cst_155 = arith.constant dense<0.000000e+00> : vector<16xf32>
    %322 = vector.multi_reduction <add>, %317, %cst_155 [1] : vector<16x32xf32> to vector<16xf32>
    %323 = vector.shape_cast %322 : vector<16xf32> to vector<16x1xf32>
    %cst_156 = arith.constant 3.200000e+01 : f32
    %324 = vector.broadcast %cst_156 : f32 to vector<16x1xf32>
    %325 = arith.divf %323, %324 : vector<16x1xf32>
    %326 = vector.broadcast %325 : vector<16x1xf32> to vector<16x32xf32>
    %327 = arith.subf %317, %326 : vector<16x32xf32>
    %328 = arith.mulf %327, %327 : vector<16x32xf32>
    %cst_157 = arith.constant dense<0.000000e+00> : vector<16xf32>
    %329 = vector.multi_reduction <add>, %328, %cst_157 [1] : vector<16x32xf32> to vector<16xf32>
    %330 = vector.shape_cast %329 : vector<16xf32> to vector<16x1xf32>
    %cst_158 = arith.constant 3.200000e+01 : f32
    %331 = vector.broadcast %cst_158 : f32 to vector<16x1xf32>
    %332 = arith.divf %330, %331 : vector<16x1xf32>
    %cst_159 = arith.constant 9.99999996E-13 : f32
    %333 = vector.broadcast %cst_159 : f32 to vector<16x1xf32>
    %334 = arith.addf %332, %333 : vector<16x1xf32>
    %335 = math.rsqrt %334 : vector<16x1xf32>
    %336 = vector.broadcast %335 : vector<16x1xf32> to vector<16x32xf32>
    %337 = arith.mulf %327, %336 : vector<16x32xf32>
    %338 = vector.broadcast %319 : vector<1x32xf32> to vector<16x32xf32>
    %339 = arith.mulf %337, %338 : vector<16x32xf32>
    %340 = vector.broadcast %321 : vector<1x32xf32> to vector<16x32xf32>
    %341 = arith.addf %339, %340 : vector<16x32xf32>
    %342 = vector.extract_strided_slice %341 {offsets = [0, 0], sizes = [1, 32], strides = [1, 1]} : vector<16x32xf32> to vector<1x32xf32>
    %343 = vector.extract_strided_slice %341 {offsets = [8, 0], sizes = [1, 32], strides = [1, 1]} : vector<16x32xf32> to vector<1x32xf32>
    %344 = tpu.concatenate %342, %343 in 0 : vector<1x32xf32>, vector<1x32xf32> -> vector<2x32xf32>
    %c0_160 = arith.constant 0 : index
    %c0_161 = arith.constant 0 : index
    %345 = vector.load %arg16[%c0_160, %c0_161] : memref<1x32xf32, #tpu.memory_space<vmem>>, vector<1x32xf32>
    %346 = vector.broadcast %345 : vector<1x32xf32> to vector<2x32xf32>
    %347 = arith.mulf %344, %346 : vector<2x32xf32>
    %cst_162 = arith.constant dense<0.000000e+00> : vector<2xf32>
    %348 = vector.multi_reduction <add>, %347, %cst_162 [1] : vector<2x32xf32> to vector<2xf32>
    %349 = vector.shape_cast %348 : vector<2xf32> to vector<2x1xf32>
    %c0_163 = arith.constant 0 : index
    %c0_164 = arith.constant 0 : index
    %350 = vector.load %arg17[%c0_163, %c0_164] : memref<1x1xf32, #tpu.memory_space<vmem>>, vector<1x1xf32>
    %351 = vector.broadcast %350 : vector<1x1xf32> to vector<2x1xf32>
    %352 = arith.addf %349, %351 : vector<2x1xf32>
    %c0_165 = arith.constant 0 : index
    %c0_166 = arith.constant 0 : index
    %353 = vector.load %arg18[%c0_165, %c0_166] : memref<2x1xf32, #tpu.memory_space<vmem>>, vector<2x1xf32>
    tpu.vector_store %arg18[%c0_165, %c0_166], %352 {strides = array<i32>} : memref<2x1xf32, #tpu.memory_space<vmem>>, vector<2x1xf32>,
    return
  }
}

</mosaic_0001>

<bundles_post_ra>
// kernel: table_retrieval_forward.1
= control target key start
LH: loop header
LB: loop body
LE: loop exit
PB: predicated region body
PF: predicated region fallthrough
CT: control target
= control target key end

     0   :  { %vm66_vm0 = vcmask 261120   ;;  %v2328_v15 = vmov 0.0   ;;  %vm2329_vm1 = vmmov 0   ;;  %vm186_vm2 = vcmask 130048   ;;  %s2332_s30 = smov 112   ;;  %s2334_s22 = smov 64   ;;  %s2763_s0 = inlined_call_operand.vmem [shape: f32[16,32], index: 0, kind: input, shape index: {}]   ;;  %s2764_s4 = inlined_call_operand.vmem [shape: bf16[2,32,96], index: 4, kind: input, shape index: {}]   ;;  %s2765_s2 = inlined_call_operand.vmem [shape: f32[1,32], index: 2, kind: input, shape index: {}]   ;;  %s2766_s3 = inlined_call_operand.vmem [shape: f32[1,32], index: 3, kind: input, shape index: {}]   ;;  %s2767_s5 = inlined_call_operand.vmem [shape: f32[2,1,96], index: 5, kind: input, shape index: {}]   ;;  %s2768_s1 = inlined_call_operand.vmem [shape: f32[16,16], index: 1, kind: input, shape index: {}]   ;;  %s2769_s6 = inlined_call_operand.vmem [shape: bf16[2,32,32], index: 6, kind: input, shape index: {}]   ;;  %s2770_s7 = inlined_call_operand.vmem [shape: f32[2,1,32], index: 7, kind: input, shape index: {}]   ;;  %s2771_s10 = inlined_call_operand.vmem [shape: bf16[2,32,64], index: 10, kind: input, shape index: {}]   ;;  %s2772_s8 = inlined_call_operand.vmem [shape: f32[2,1,32], index: 8, kind: input, shape index: {}]   ;;  %s2773_s9 = inlined_call_operand.vmem [shape: f32[2,1,32], index: 9, kind: input, shape index: {}]   ;;  %s2774_s12 = inlined_call_operand.vmem [shape: bf16[2,64,32], index: 12, kind: input, shape index: {}]   ;;  %s2775_s11 = inlined_call_operand.vmem [shape: f32[2,1,64], index: 11, kind: input, shape index: {}]   ;;  %s2776_s13 = inlined_call_operand.vmem [shape: f32[2,1,32], index: 13, kind: input, shape index: {}]   ;;  %s2777_s14 = inlined_call_operand.vmem [shape: f32[2,1,32], index: 14, kind: input, shape index: {}]   ;;  %s2778_s15 = inlined_call_operand.vmem [shape: f32[2,1,32], index: 15, kind: input, shape index: {}]   ;;  %s2779_s17 = inlined_call_operand.<no memory space> [shape: f32[1,1], index: 17, kind: input, shape index: {}]   ;;  %s2780_s16 = inlined_call_operand.vmem [shape: f32[1,32], index: 16, kind: input, shape index: {}]   ;;  %s2781_s18 = inlined_call_operand.vmem [shape: f32[2,1], index: 18, kind: output, shape index: {}]  }
   0x1   :  { %2784 = sst [smem:[#allocation3_spill]] %s2763_s0  ;;  %2013 = vmatprep.subr.bf16.mxu1 %v2328_v15  ;;  %2017 = vmatprep.mubr.msk.bf16.mxu1 %vm2329_vm1, %v2328_v15  ;;  %v1854_v29 = vld [vmem:[%s2766_s3] ss:$0 sm:$0xff]  ;;  %s2330_s3 = smov 80   ;;  %vm2479_vm3 = vmpackc.low %vm186_vm2, %vm186_vm2  ;;  %v2500_v54 = vld [vmem:[%s2768_s1 + $0x8] sm:$0xff]  ;;  %vm871_vm6 = vcmask 523264  }
   0x2   :  { %2785 = sst [smem:[#allocation4_spill]] %s2764_s4  ;;  %s2787_s29 = sld [smem:[#allocation3_spill]]  ;;  %v1855_v34 = vld [vmem:[%s2767_s5] ss:$0 sm:$0xff]  ;;  %vm1825_vm9 = vcmask 1040384   ;;  %vm1835_vm10 = vcmask 254976  }
   0x3   :  { %2786 = sst [smem:[#allocation5_spill]] %s2765_s2  ;;  %s2788_s20 = sld [smem:[#allocation4_spill]]  ;;  %v2505_v58 = vld [vmem:[%s2768_s1] sm:$0xff]  ;;  %vm1847_vm11 = vcmask 1024  }
   0x4   :  { %s2789_s24 = sld [smem:[#allocation5_spill]]  ;;  %s2333_s1 = smov 48  }
   0x5   :  { %s2335_s26 = smov 16  }
   0x8   :  { %v62_v0 = vld [vmem:[%s2787_s29] sm:$0xff]  ;;  %v63_v1 = vld [vmem:[%s2787_s29 + $0x8] sm:$0xff]  ;;  %s2331_s29 = smov 96  }
   0x9   :  { %v67_v2 = vsel %vm66_vm0, %v62_v0, 0.0  ;;  %v70_v3 = vsel %vm66_vm0, %v63_v1, 0.0  ;;  %v2240_v14 = vld [vmem:[%s2788_s20] sm:$0xff]   ;;  %v2241_v16 = vld [vmem:[%s2788_s20 + $0x8] sm:$0xff]  }
   0xa   :  { %68 = vadd.xlane.f32.xlu0 %v67_v2  ;;  %2014 = vmatpush3.bf16.msra.mxu1 %v2240_v14  ;;  %v1853_v25 = vld [vmem:[%s2789_s24] ss:$0 sm:$0xff] }
   0xb   :  { %2015 = vmatprep.subr.bf16.mxu1 %v2328_v15 }
   0xe   :  { %71 = vadd.xlane.f32.xlu0 %v70_v3  ;;  %2016 = vmatpush3.bf16.msra.mxu1 %v2241_v16 }
  0x97   :  { %v69_v4 = vpop.xlane.xlu0 %68 }
  0x98   :  { %v74_v5 = vmul.f32 0.03125, %v69_v4 }
  0x9a   :  { %v76_v6 = vsub.f32 %v62_v0, %v74_v5 }
  0x9b   :  { %v72_v7 = vpop.xlane.xlu0 %71 }
  0x9c   :  { %v75_v8 = vmul.f32 0.03125, %v72_v7  ;;  %v78_v9 = vmul.f32 %v76_v6, %v76_v6 }
  0x9e   :  { %v77_v10 = vsub.f32 %v63_v1, %v75_v8  ;;  %v80_v11 = vsel %vm66_vm0, %v78_v9, 0.0 }
  0x9f   :  { %81 = vadd.xlane.f32.xlu1 %v80_v11 }
  0xa0   :  { %v79_v12 = vmul.f32 %v77_v10, %v77_v10 }
  0xa2   :  { %v83_v13 = vsel %vm66_vm0, %v79_v12, 0.0 }
  0xa3   :  { %84 = vadd.xlane.f32.xlu1 %v83_v13 }
 0x12c   :  { %v82_v17 = vpop.xlane.xlu1 %81 }
 0x12d   :  { %v86_v18 = vmul.f32 0.03125, %v82_v17 }
 0x12f   :  { %v88_v19 = vadd.f32 1e-12, %v86_v18 }
 0x130   :  { %v85_v20 = vpop.xlane.xlu1 %84 }
 0x131   :  { %2260 = vrsqrt.f32 %v88_v19  ;;  %v87_v21 = vmul.f32 0.03125, %v85_v20 }
 0x133   :  { %v89_v22 = vadd.f32 1e-12, %v87_v21 }
 0x135   :  { %2262 = vrsqrt.f32 %v89_v22 }
 0x13b   :  { %v2261_v23 = vpop.eup %2260 }
 0x13c   :  { %v92_v24 = vmul.f32 %v2261_v23, %v76_v6 }
 0x13e   :  { %v100_v28 = vmul.f32 %v1853_v25, %v92_v24 }
 0x13f   :  { %v2263_v26 = vpop.eup %2262 }
 0x140   :  { %v93_v27 = vmul.f32 %v2263_v26, %v77_v10  ;;  %v2458_v31 = vadd.f32 %v1854_v29, %v100_v28 }
 0x142   :  { %v101_v30 = vmul.f32 %v1853_v25, %v93_v27 }
 0x144   :  { %v2460_v32 = vadd.f32 %v1854_v29, %v101_v30 }
 0x146   :  { %v112_v33 = vpack.c.bf16 %v2460_v32, %v2458_v31 }
 0x148   :  { %2018 = vmatmul.mubr.msk.bf16.vlgmr.msra.gmra.mrb[0].mxu1 %vm66_vm0, %v112_v33 }
 0x21b   :  { %v173_v35 = vpop.f32.mrb[0].mxu1 }
 0x21c   :  { %v174_v36 = vadd.f32 %v1855_v34, %v173_v35  ;;  %v2019_v37 = vpop.f32.mrb[1].mxu1 }
 0x21d   :  { %v176_v38 = vpop.f32.mrb[2].mxu1 }
 0x21e   :  { %v177_v39 = vadd.f32 %v1855_v34, %v176_v38  ;;  %v2020_v40 = vpop.f32.mrb[3].mxu1  ;;  %2025 = vmatprep.mubr.msk.f32.mxu1 %vm186_vm2, %v174_v36 }
 0x220   :  { %v2469_v41 = vpack.i.bf16 %v177_v39, %v174_v36 }
 0x222   :  { %2196 = vrot.lane.b32.xlu1 %v2469_v41, %s2330_s3  ;;  %2191 = vrot.lane.b32.xlu0 %v2469_v41, %s2331_s29 }
 0x226   :  { %383 = vrot.lane.b32.xlu1 %v174_v36, %s2332_s30 }
 0x22a   :  { %385 = vrot.lane.b32.xlu1 %v177_v39, %s2332_s30 }
 0x294   :  { %v2197_v42 = vpop.permute.xlu1 %2196  ;;  %v2192_v43 = vpop.permute.xlu0 %2191 }
 0x295   :  { %v2199_v44 = vunpack.i.h.bf16 %v2197_v42  ;;  %v2198_v45 = vunpack.i.l.bf16 %v2197_v42  ;;  %v2194_v46 = vunpack.i.h.bf16 %v2192_v43  ;;  %v2193_v47 = vunpack.i.l.bf16 %v2192_v43 }
 0x297   :  { %v2141_v49 = vpack.c.bf16 %v2194_v46, %v2193_v47  ;;  %v2151_v50 = vpack.c.bf16 %v2199_v44, %v2198_v45 }
 0x298   :  { %v384_v51 = vpop.permute.xlu1 %383 }
 0x299   :  { %2143 = vmatprep.subr.msk.bf16.mxu1 %vm2479_vm3, %v2141_v49  ;;  %2153 = vmatprep.subr.msk.bf16.mxu0 %vm2479_vm3, %v2151_v50 }
 0x29a   :  { %2039 = vmatprep.mubr.msk.f32.mxu0 %vm186_vm2, %v384_v51  ;;  %2146 = vmatpush3.bf16.xpose.msk.msra.mxu1 %vm2479_vm3, %v2141_v49  ;;  %v2242_v51 = vld [vmem:[%s2769_s6] sm:$0xff]  }
 0x29b   :  { %2156 = vmatpush3.bf16.xpose.msk.msra.mxu0 %vm2479_vm3, %v2151_v50 }
 0x29c   :  { %2049 = vmatprep.subr.bf16.mxu0 %v2328_v15  ;;  %v386_v52 = vpop.permute.xlu1 %385 }
 0x2a1   :  { %2026 = vmatmul.mubr.msk.f32.vlgmr.msra.gmra.mrb[4].mxu1 %vm186_vm2, %v177_v39 }
 0x2a2   :  { %2040 = vmatmul.mubr.msk.f32.vlgmr.msra.gmra.mrb[0].mxu0 %vm186_vm2, %v386_v52  ;;  %v2243_v52 = vld [vmem:[%s2769_s6 + $0x8] sm:$0xff]  }
 0x2a3   :  { %2053 = vmatprep.mubr.msk.bf16.mxu0 %vm2329_vm1, %v2328_v15  ;;  %2050 = vmatpush3.bf16.msra.mxu0 %v2242_v51 }
 0x2a4   :  { %2051 = vmatprep.subr.bf16.mxu0 %v2328_v15 }
 0x2a7   :  { %2052 = vmatpush3.bf16.msra.mxu0 %v2243_v52 }
 0x2a8   :  { %2065 = vmatprep.subr.bf16.mxu0 %v2328_v15 }
 0x374   :  { %v2027_v53 = vpop.f32.mrb[4].mxu1 }
 0x375   :  { %v271_v55 = vmul.f32 0.25, %v2027_v53  ;;  %v2041_v56 = vpop.f32.mrb[0].mxu0  ;;  %v261_v57 = vpop.f32.mrb[5].mxu1 }
 0x376   :  { %v270_v59 = vmul.f32 0.25, %v261_v57  ;;  %v465_v60 = vpop.f32.mrb[1].mxu0  ;;  %v475_v1 = vmul.f32 0.25, %v2041_v56 }
 0x377   :  { %v474_v61 = vmul.f32 0.25, %v465_v60  ;;  %v273_v62 = vadd.f32 %v271_v55, %v2500_v54 }
 0x378   :  { %v272_v63 = vadd.f32 %v270_v59, %v2505_v58  ;;  %v477_v5 = vadd.f32 %v475_v1, %v2500_v54 }
 0x379   :  { %v277_v0 = vsel %vm186_vm2, %v273_v62, -inf  ;;  %v476_v3 = vadd.f32 %v474_v61, %v2505_v58 }
 0x37a   :  { %278 = vmax.xlane.f32.xlu1 %v277_v0  ;;  %v274_v2 = vsel %vm186_vm2, %v272_v63, -inf  ;;  %v481_v6 = vsel %vm186_vm2, %v477_v5, -inf }
 0x37b   :  { %275 = vmax.xlane.f32.xlu0 %v274_v2  ;;  %v478_v4 = vsel %vm186_vm2, %v476_v3, -inf  ;;  %v1871_v2 = vld [vmem:[%s2770_s7] ss:$0 sm:$0xff] }
 0x37f   :  { %479 = vmax.xlane.f32.xlu0 %v478_v4 }
 0x383   :  { %482 = vmax.xlane.f32.xlu0 %v481_v6 }
 0x407   :  { %v279_v7 = vpop.xlane.xlu1 %278 }
 0x408   :  { %v281_v8 = vsub.f32 %v273_v62, %v279_v7  ;;  %v276_v9 = vpop.xlane.xlu0 %275 }
 0x409   :  { %v280_v10 = vsub.f32 %v272_v63, %v276_v9 }
 0x40a   :  { %v284_v11 = vmul.f32 1.442695, %v281_v8 }
 0x40b   :  { %v282_v12 = vmul.f32 1.442695, %v280_v10 }
 0x40c   :  { %2264 = vpow2.f32 %v284_v11  ;;  %v480_v13 = vpop.xlane.xlu0 %479 }
 0x40d   :  { %2266 = vpow2.f32 %v282_v12  ;;  %v484_v14 = vsub.f32 %v476_v3, %v480_v13 }
 0x40f   :  { %v486_v16 = vmul.f32 1.442695, %v484_v14 }
 0x410   :  { %v483_v17 = vpop.xlane.xlu0 %482 }
 0x411   :  { %2268 = vpow2.f32 %v486_v16  ;;  %v485_v18 = vsub.f32 %v477_v5, %v483_v17 }
 0x413   :  { %v488_v19 = vmul.f32 1.442695, %v485_v18 }
 0x415   :  { %2270 = vpow2.f32 %v488_v19 }
 0x416   :  { %v2265_v20 = vpop.eup %2264 }
 0x417   :  { %v2267_v21 = vpop.eup %2266  ;;  %v289_v22 = vsel %vm186_vm2, %v2265_v20, 0.0 }
 0x418   :  { %290 = vadd.xlane.f32.xlu1 %v289_v22  ;;  %v286_v23 = vsel %vm186_vm2, %v2267_v21, 0.0 }
 0x419   :  { %287 = vadd.xlane.f32.xlu0 %v286_v23  ;;  %v2245_v23 = vld [vmem:[%s2771_s10 + $0x8] sm:$0xff]  }
 0x41b   :  { %v2269_v24 = vpop.eup %2268 }
 0x41c   :  { %v490_v25 = vsel %vm186_vm2, %v2269_v24, 0.0 }
 0x41d   :  { %491 = vadd.xlane.f32.xlu0 %v490_v25 }
 0x41f   :  { %v2271_v26 = vpop.eup %2270 }
 0x420   :  { %v493_v27 = vsel %vm186_vm2, %v2271_v26, 0.0 }
 0x421   :  { %494 = vadd.xlane.f32.xlu1 %v493_v27 }
 0x432   :  { %2206 = vrot.lane.b32.xlu1 %v2469_v41, %s2333_s1 }
 0x433   :  { %2201 = vrot.lane.b32.xlu0 %v2469_v41, %s2334_s22 }
 0x4a5   :  { %v291_v28 = vpop.xlane.xlu1 %290 }
 0x4a6   :  { %v288_v29 = vpop.xlane.xlu0 %287 }
 0x4a7   :  { %2272 = vrcp.f32 %v288_v29 }
 0x4a8   :  { %2274 = vrcp.f32 %v291_v28 }
 0x4aa   :  { %v492_v30 = vpop.xlane.xlu0 %491 }
 0x4ab   :  { %2276 = vrcp.f32 %v492_v30 }
 0x4ae   :  { %v495_v33 = vpop.xlane.xlu1 %494  ;;  %v2202_v34 = vpop.permute.xlu0 %2201 }
 0x4af   :  { %2278 = vrcp.f32 %v495_v33  ;;  %v2204_v35 = vunpack.i.h.bf16 %v2202_v34  ;;  %v2203_v36 = vunpack.i.l.bf16 %v2202_v34  ;;  %v1875_v34 = vld [vmem:[%s2772_s8] ss:$0 sm:$0xff] }
 0x4b1   :  { %v2273_v37 = vpop.eup %2272  ;;  %v2147_v38 = vpack.c.bf16 %v2204_v35, %v2203_v36 }
 0x4b2   :  { %v2275_v39 = vpop.eup %2274  ;;  %v2207_v40 = vpop.permute.xlu1 %2206  ;;  %v294_v42 = vmul.f32 %v2273_v37, %v2267_v21 }
 0x4b3   :  { %v2209_v43 = vunpack.i.h.bf16 %v2207_v40  ;;  %v2208_v44 = vunpack.i.l.bf16 %v2207_v40  ;;  %2148 = vmatprep.subr.bf16.mxu1 %v2147_v38  ;;  %v295_v45 = vmul.f32 %v2275_v39, %v2265_v20 }
 0x4b4   :  { %2150 = vmatpush3.bf16.msra.mxu1 %v2147_v38  ;;  %2032 = vmatprep.mubr.msk.f32.mxu1 %vm186_vm2, %v294_v42  ;;  %v1876_v38 = vld [vmem:[%s2773_s9] ss:$0 sm:$0xff] }
 0x4b5   :  { %v2277_v41 = vpop.eup %2276  ;;  %v2157_v46 = vpack.c.bf16 %v2209_v43, %v2208_v44  ;;  %v2246_v44 = vld [vmem:[%s2774_s12] sm:$0xff]  }
 0x4b6   :  { %v498_v47 = vmul.f32 %v2277_v41, %v2269_v24  ;;  %v2247_v41 = vld [vmem:[%s2774_s12 + $0x8] sm:$0xff]  }
 0x4b7   :  { %2033 = vmatmul.mubr.msk.f32.vlgmr.msra.gmra.mrb[6].mxu1 %vm186_vm2, %v295_v45  ;;  %2158 = vmatprep.subr.bf16.mxu1 %v2157_v46  ;;  %v2248_v45 = vld [vmem:[%s2774_s12 + $0x10] sm:$0xff]  }
 0x4b8   :  { %2160 = vmatpush3.bf16.msra.mxu1 %v2157_v46  ;;  %2046 = vmatprep.mubr.msk.f32.mxu1 %vm186_vm2, %v498_v47  ;;  %v2249_v46 = vld [vmem:[%s2774_s12 + $0x18] sm:$0xff]   ;;  %v1877_v47 = vld [vmem:[%s2775_s11] ss:$0 sm:$0xff] }
 0x4b9   :  { %v2279_v49 = vpop.eup %2278  ;;  %2057 = vmatprep.subr.bf16.mxu1 %v2328_v15 }
 0x4ba   :  { %v499_v50 = vmul.f32 %v2279_v49, %v2271_v26 }
 0x4bc   :  { %2047 = vmatmul.mubr.msk.f32.vlgmr.msra.gmra.mrb[8].mxu1 %vm186_vm2, %v499_v50 }
 0x4bd   :  { %2061 = vmatprep.mubr.msk.bf16.mxu1 %vm2329_vm1, %v2328_v15 }
 0x58a   :  { %v2034_v53 = vpop.f32.mrb[6].mxu1 }
 0x58b   :  { %v374_v55 = vpop.f32.mrb[7].mxu1 }
 0x58f   :  { %v2048_v56 = vpop.f32.mrb[8].mxu1 }
 0x590   :  { %v578_v57 = vpop.f32.mrb[9].mxu1 }
 0x591   :  { %v2210_v59 = vpack.i.bf16 %v2048_v56, %v578_v57 }
 0x593   :  { %2211 = vrot.lane.b32.xlu1 %v2210_v59, %s2335_s26  ;;  %v2336_v59 = vmov 1.0  }
 0x605   :  { %v2212_v60 = vpop.permute.xlu1 %2211 }
 0x606   :  { %v2214_v61 = vunpack.i.h.bf16 %v2212_v60  ;;  %v2213_v62 = vunpack.i.l.bf16 %v2212_v60 }
 0x608   :  { %v596_v63 = vsel %vm186_vm2, %v2034_v53, %v2214_v61  ;;  %v595_v0 = vsel %vm186_vm2, %v374_v55, %v2213_v62 }
 0x609   :  { %v597_v1 = vpack.c.bf16 %v596_v63, %v595_v0 }
 0x60b   :  { %2054 = vmatmul.mubr.msk.bf16.vlgmr.msra.gmra.mrb[4].mxu0 %vm66_vm0, %v597_v1 }
 0x60c   :  { %2073 = vmatprep.mubr.msk.bf16.mxu0 %vm2329_vm1, %v2328_v15  ;;  %2066 = vmatpush3.bf16.msra.mxu0 %v2246_v44 }
 0x60d   :  { %2067 = vmatprep.subr.bf16.mxu0 %v2328_v15 }
 0x610   :  { %2068 = vmatpush3.bf16.msra.mxu0 %v2247_v41 }
 0x611   :  { %2069 = vmatprep.subr.bf16.mxu0 %v2328_v15 }
 0x614   :  { %2070 = vmatpush3.bf16.msra.mxu0 %v2248_v45 }
 0x615   :  { %2071 = vmatprep.subr.bf16.mxu0 %v2328_v15 }
 0x618   :  { %2072 = vmatpush3.bf16.msra.mxu0 %v2249_v46 }
 0x6de   :  { %v658_v3 = vpop.f32.mrb[4].mxu0 }
 0x6df   :  { %v659_v4 = vadd.f32 %v1871_v2, %v658_v3  ;;  %v2055_v5 = vpop.f32.mrb[5].mxu0 }
 0x6e0   :  { %v661_v6 = vpop.f32.mrb[6].mxu0 }
 0x6e1   :  { %v662_v7 = vadd.f32 %v1871_v2, %v661_v6  ;;  %v2056_v8 = vpop.f32.mrb[7].mxu0  ;;  %v665_v9 = vadd.f32 %v659_v4, %v2458_v31 }
 0x6e3   :  { %v669_v10 = vsel %vm66_vm0, %v665_v9, 0.0  ;;  %v666_v11 = vadd.f32 %v662_v7, %v2460_v32  ;;  %v2244_v32 = vld [vmem:[%s2771_s10] sm:$0xff]  }
 0x6e4   :  { %670 = vadd.xlane.f32.xlu1 %v669_v10  ;;  %2058 = vmatpush3.bf16.msra.mxu1 %v2244_v32 }
 0x6e5   :  { %v672_v12 = vsel %vm66_vm0, %v666_v11, 0.0  ;;  %2059 = vmatprep.subr.bf16.mxu1 %v2328_v15 }
 0x6e6   :  { %673 = vadd.xlane.f32.xlu0 %v672_v12 }
 0x6e8   :  { %2060 = vmatpush3.bf16.msra.mxu1 %v2245_v23 }
 0x6e9   :  { %2077 = vmatprep.subr.bf16.mxu1 %v2328_v15 }
 0x771   :  { %v671_v13 = vpop.xlane.xlu1 %670 }
 0x772   :  { %v675_v14 = vmul.f32 0.03125, %v671_v13 }
 0x773   :  { %v674_v16 = vpop.xlane.xlu0 %673 }
 0x774   :  { %v677_v17 = vsub.f32 %v665_v9, %v675_v14  ;;  %v676_v18 = vmul.f32 0.03125, %v674_v16 }
 0x776   :  { %v678_v19 = vsub.f32 %v666_v11, %v676_v18  ;;  %v679_v20 = vmul.f32 %v677_v17, %v677_v17 }
 0x778   :  { %v681_v21 = vsel %vm66_vm0, %v679_v20, 0.0  ;;  %v680_v22 = vmul.f32 %v678_v19, %v678_v19 }
 0x779   :  { %682 = vadd.xlane.f32.xlu0 %v681_v21 }
 0x77a   :  { %v684_v31 = vsel %vm66_vm0, %v680_v22, 0.0 }
 0x77d   :  { %685 = vadd.xlane.f32.xlu0 %v684_v31 }
 0x806   :  { %v683_v24 = vpop.xlane.xlu0 %682 }
 0x807   :  { %v687_v25 = vmul.f32 0.03125, %v683_v24 }
 0x809   :  { %v689_v26 = vadd.f32 1e-12, %v687_v25 }
 0x80a   :  { %v686_v27 = vpop.xlane.xlu0 %685 }
 0x80b   :  { %2280 = vrsqrt.f32 %v689_v26  ;;  %v688_v28 = vmul.f32 0.03125, %v686_v27 }
 0x80d   :  { %v690_v29 = vadd.f32 1e-12, %v688_v28 }
 0x80f   :  { %2282 = vrsqrt.f32 %v690_v29 }
 0x815   :  { %v2281_v30 = vpop.eup %2280 }
 0x816   :  { %v693_v33 = vmul.f32 %v2281_v30, %v677_v17 }
 0x818   :  { %v701_v36 = vmul.f32 %v1875_v34, %v693_v33 }
 0x819   :  { %v2283_v35 = vpop.eup %2282 }
 0x81a   :  { %v694_v37 = vmul.f32 %v2283_v35, %v678_v19  ;;  %v2567_v40 = vadd.f32 %v1876_v38, %v701_v36 }
 0x81c   :  { %v702_v39 = vmul.f32 %v1875_v34, %v694_v37 }
 0x81e   :  { %v2569_v42 = vadd.f32 %v1876_v38, %v702_v39 }
 0x820   :  { %v711_v43 = vpack.c.bf16 %v2569_v42, %v2567_v40 }
 0x822   :  { %2062 = vmatmul.mubr.msk.bf16.vlgmr.msra.gmra.mrb[12].mxu1 %vm66_vm0, %v711_v43 }
 0x823   :  { %2081 = vmatprep.mubr.msk.bf16.mxu1 %vm2329_vm1, %v2328_v15 }
 0x8f5   :  { %v772_v49 = vpop.f32.mrb[12].mxu1 }
 0x8f6   :  { %v773_v50 = vadd.f32 %v1877_v47, %v772_v49  ;;  %v2063_v51 = vpop.f32.mrb[13].mxu1  ;;  %v1881_v49 = vld [vmem:[%s2776_s13] ss:$0 sm:$0xff] }
 0x8f7   :  { %v775_v52 = vpop.f32.mrb[14].mxu1 }
 0x8f8   :  { %v781_v53 = vmul.f32 0.70710677, %v773_v50  ;;  %v776_v55 = vadd.f32 %v1877_v47, %v775_v52  ;;  %v2064_v56 = vpop.f32.mrb[15].mxu1  ;;  %v779_v43 = vmul.f32 0.5, %v773_v50 }
 0x8fa   :  { %vm783_vm4 = vcmp.lt.f32.partialorder %v781_v53, 0.0  ;;  %v782_v57 = vmul.f32 0.70710677, %v776_v55  ;;  %v780_v44 = vmul.f32 0.5, %v776_v55 }
 0x8fb   :  { %v785_v60 = vsel %vm783_vm4, -1.0, %v2336_v59 }
 0x8fc   :  { %v787_v61 = vmul.f32 %v785_v60, %v781_v53  ;;  %vm784_vm5 = vcmp.lt.f32.partialorder %v782_v57, 0.0 }
 0x8fd   :  { %v786_v62 = vsel %vm784_vm5, -1.0, %v2336_v59 }
 0x8fe   :  { %v789_v63 = vmul.f32 0.3275911, %v787_v61  ;;  %v788_v0 = vmul.f32 %v786_v62, %v782_v57  ;;  %v813_v4 = vsub.f32 0.0, %v787_v61 }
 0x900   :  { %v791_v1 = vadd.f32 1.0, %v789_v63  ;;  %v790_v2 = vmul.f32 0.3275911, %v788_v0  ;;  %v814_v5 = vsub.f32 0.0, %v788_v0  ;;  %v815_v7 = vmul.f32 %v813_v4, %v787_v61 }
 0x902   :  { %2284 = vrcp.f32 %v791_v1  ;;  %v792_v3 = vadd.f32 1.0, %v790_v2  ;;  %v816_v11 = vmul.f32 %v814_v5, %v788_v0  ;;  %v817_v12 = vmul.f32 1.442695, %v815_v7 }
 0x904   :  { %2286 = vrcp.f32 %v792_v3  ;;  %v819_v18 = vmul.f32 1.442695, %v816_v11 }
 0x905   :  { %2288 = vpow2.f32 %v817_v12 }
 0x906   :  { %2290 = vpow2.f32 %v819_v18 }
 0x90c   :  { %v2285_v6 = vpop.eup %2284 }
 0x90d   :  { %v795_v8 = vmul.f32 1.0614054, %v2285_v6 }
 0x90e   :  { %v2287_v9 = vpop.eup %2286 }
 0x90f   :  { %v797_v10 = vadd.f32 -1.4531521, %v795_v8  ;;  %v796_v13 = vmul.f32 1.0614054, %v2287_v9  ;;  %v2289_v27 = vpop.eup %2288  ;;  %v2251_v8 = vld [vmem:[%s2788_s20 + $0x18] sm:$0xff]  }
 0x910   :  { %v2291_v33 = vpop.eup %2290 }
 0x911   :  { %v799_v14 = vmul.f32 %v2285_v6, %v797_v10  ;;  %v798_v16 = vadd.f32 -1.4531521, %v796_v13 }
 0x913   :  { %v801_v17 = vadd.f32 1.4214138, %v799_v14  ;;  %v800_v19 = vmul.f32 %v2287_v9, %v798_v16 }
 0x915   :  { %v803_v20 = vmul.f32 %v2285_v6, %v801_v17  ;;  %v802_v21 = vadd.f32 1.4214138, %v800_v19  ;;  %v1887_v17 = vld [vmem:[%s2777_s14] ss:$0 sm:$0xff] }
 0x917   :  { %v805_v22 = vadd.f32 -0.28449672, %v803_v20  ;;  %v804_v31 = vmul.f32 %v2287_v9, %v802_v21 }
 0x919   :  { %v807_v32 = vmul.f32 %v2285_v6, %v805_v22  ;;  %v806_v23 = vadd.f32 -0.28449672, %v804_v31  ;;  %v1888_v22 = vld [vmem:[%s2778_s15] ss:$0 sm:$0xff] }
 0x91b   :  { %v809_v24 = vadd.f32 0.2548296, %v807_v32  ;;  %v808_v25 = vmul.f32 %v2287_v9, %v806_v23 }
 0x91d   :  { %v811_v26 = vmul.f32 %v2285_v6, %v809_v24  ;;  %v810_v28 = vadd.f32 0.2548296, %v808_v25  ;;  %v1894_v25 = vld [vmem:[%s2767_s5 + $0x1] ss:$0 sm:$0xff] }
 0x91f   :  { %v821_v29 = vmul.f32 %v2289_v27, %v811_v26  ;;  %v812_v30 = vmul.f32 %v2287_v9, %v810_v28 }
 0x921   :  { %v823_v34 = vsub.f32 1.0, %v821_v29  ;;  %v822_v35 = vmul.f32 %v2291_v33, %v812_v30 }
 0x923   :  { %v825_v36 = vmul.f32 %v823_v34, %v785_v60  ;;  %v824_v37 = vsub.f32 1.0, %v822_v35 }
 0x925   :  { %v827_v38 = vadd.f32 1.0, %v825_v36  ;;  %v826_v39 = vmul.f32 %v824_v37, %v786_v62 }
 0x927   :  { %v828_v41 = vadd.f32 1.0, %v826_v39  ;;  %v829_v45 = vmul.f32 %v827_v38, %v779_v43 }
 0x929   :  { %v830_v46 = vmul.f32 %v828_v41, %v780_v44 }
 0x92b   :  { %v831_v47 = vpack.c.bf16 %v830_v46, %v829_v45 }
 0x92d   :  { %2074 = vmatmul.mubr.msk.bf16.vlgmr.msra.gmra.mrb[8].mxu0 %vm871_vm6, %v831_v47 }
 0xa00   :  { %v909_v51 = vpop.f32.mrb[8].mxu0 }
 0xa01   :  { %v910_v52 = vadd.f32 %v1881_v49, %v909_v51  ;;  %v2075_v53 = vpop.f32.mrb[9].mxu0 }
 0xa02   :  { %v912_v56 = vpop.f32.mrb[10].mxu0 }
 0xa03   :  { %v913_v57 = vadd.f32 %v1881_v49, %v912_v56  ;;  %v2076_v60 = vpop.f32.mrb[11].mxu0  ;;  %v916_v50 = vadd.f32 %v910_v52, %v2567_v40 }
 0xa05   :  { %v920_v55 = vsel %vm66_vm0, %v916_v50, 0.0  ;;  %v917_v61 = vadd.f32 %v913_v57, %v2569_v42  ;;  %v2250_v42 = vld [vmem:[%s2788_s20 + $0x10] sm:$0xff]  }
 0xa06   :  { %921 = vadd.xlane.f32.xlu1 %v920_v55  ;;  %2078 = vmatpush3.bf16.msra.mxu1 %v2250_v42 }
 0xa07   :  { %v923_v62 = vsel %vm66_vm0, %v917_v61, 0.0  ;;  %2079 = vmatprep.subr.bf16.mxu1 %v2328_v15 }
 0xa08   :  { %924 = vadd.xlane.f32.xlu0 %v923_v62 }
 0xa0a   :  { %2080 = vmatpush3.bf16.msra.mxu1 %v2251_v8 }
 0xa93   :  { %v922_v63 = vpop.xlane.xlu1 %921 }
 0xa94   :  { %v926_v0 = vmul.f32 0.03125, %v922_v63 }
 0xa95   :  { %v925_v1 = vpop.xlane.xlu0 %924 }
 0xa96   :  { %v928_v2 = vsub.f32 %v916_v50, %v926_v0  ;;  %v927_v3 = vmul.f32 0.03125, %v925_v1 }
 0xa98   :  { %v929_v4 = vsub.f32 %v917_v61, %v927_v3  ;;  %v930_v5 = vmul.f32 %v928_v2, %v928_v2 }
 0xa9a   :  { %v932_v6 = vsel %vm66_vm0, %v930_v5, 0.0  ;;  %v931_v7 = vmul.f32 %v929_v4, %v929_v4 }
 0xa9b   :  { %933 = vadd.xlane.f32.xlu1 %v932_v6 }
 0xa9c   :  { %v935_v40 = vsel %vm66_vm0, %v931_v7, 0.0 }
 0xa9d   :  { %936 = vadd.xlane.f32.xlu0 %v935_v40 }
 0xb28   :  { %v934_v9 = vpop.xlane.xlu1 %933 }
 0xb29   :  { %v938_v10 = vmul.f32 0.03125, %v934_v9 }
 0xb2a   :  { %v937_v11 = vpop.xlane.xlu0 %936 }
 0xb2b   :  { %v940_v12 = vadd.f32 1e-12, %v938_v10  ;;  %v939_v13 = vmul.f32 0.03125, %v937_v11 }
 0xb2d   :  { %2292 = vrsqrt.f32 %v940_v12  ;;  %v941_v14 = vadd.f32 1e-12, %v939_v13 }
 0xb2f   :  { %2294 = vrsqrt.f32 %v941_v14 }
 0xb37   :  { %v2293_v16 = vpop.eup %2292 }
 0xb38   :  { %v944_v18 = vmul.f32 %v2293_v16, %v928_v2 }
 0xb39   :  { %v2295_v19 = vpop.eup %2294 }
 0xb3a   :  { %v952_v20 = vmul.f32 %v1887_v17, %v944_v18  ;;  %v945_v21 = vmul.f32 %v2295_v19, %v929_v4 }
 0xb3c   :  { %v953_v31 = vmul.f32 %v1887_v17, %v945_v21  ;;  %v2619_v32 = vadd.f32 %v1888_v22, %v952_v20 }
 0xb3e   :  { %v2621_v23 = vadd.f32 %v1888_v22, %v953_v31 }
 0xb40   :  { %v962_v24 = vpack.c.bf16 %v2621_v23, %v2619_v32 }
 0xb42   :  { %2082 = vmatmul.mubr.msk.bf16.vlgmr.msra.gmra.mrb[16].mxu1 %vm66_vm0, %v962_v24 }
 0xc15   :  { %v1025_v26 = vpop.f32.mrb[16].mxu1 }
 0xc16   :  { %v1026_v27 = vadd.f32 %v1894_v25, %v1025_v26  ;;  %v2083_v28 = vpop.f32.mrb[17].mxu1 }
 0xc17   :  { %v1028_v29 = vpop.f32.mrb[18].mxu1 }
 0xc18   :  { %v1029_v30 = vadd.f32 %v1894_v25, %v1028_v29  ;;  %v2084_v33 = vpop.f32.mrb[19].mxu1  ;;  %2089 = vmatprep.mubr.msk.f32.mxu1 %vm186_vm2, %v1026_v27 }
 0xc1a   :  { %v2630_v34 = vpack.i.bf16 %v1029_v30, %v1026_v27 }
 0xc1c   :  { %2221 = vrot.lane.b32.xlu0 %v2630_v34, %s2330_s3  ;;  %2216 = vrot.lane.b32.xlu1 %v2630_v34, %s2331_s29 }
 0xc20   :  { %1234 = vrot.lane.b32.xlu1 %v1026_v27, %s2332_s30 }
 0xc24   :  { %1236 = vrot.lane.b32.xlu1 %v1029_v30, %s2332_s30 }
 0xc8e   :  { %v2222_v35 = vpop.permute.xlu0 %2221  ;;  %v2217_v36 = vpop.permute.xlu1 %2216 }
 0xc8f   :  { %v2224_v37 = vunpack.i.h.bf16 %v2222_v35  ;;  %v2223_v38 = vunpack.i.l.bf16 %v2222_v35  ;;  %v2219_v39 = vunpack.i.h.bf16 %v2217_v36  ;;  %v2218_v43 = vunpack.i.l.bf16 %v2217_v36 }
 0xc91   :  { %v2171_v44 = vpack.c.bf16 %v2224_v37, %v2223_v38  ;;  %v2161_v41 = vpack.c.bf16 %v2219_v39, %v2218_v43 }
 0xc92   :  { %v1235_v45 = vpop.permute.xlu1 %1234 }
 0xc93   :  { %2163 = vmatprep.subr.msk.bf16.mxu1 %vm2479_vm3, %v2161_v41  ;;  %2173 = vmatprep.subr.msk.bf16.mxu0 %vm2479_vm3, %v2171_v44 }
 0xc94   :  { %2103 = vmatprep.mubr.msk.f32.mxu0 %vm186_vm2, %v1235_v45  ;;  %2166 = vmatpush3.bf16.xpose.msk.msra.mxu1 %vm2479_vm3, %v2161_v41  ;;  %v2253_v41 = vld [vmem:[%s2769_s6 + $0x18] sm:$0xff]  }
 0xc95   :  { %2176 = vmatpush3.bf16.xpose.msk.msra.mxu0 %vm2479_vm3, %v2171_v44  ;;  %v2252_v44 = vld [vmem:[%s2769_s6 + $0x10] sm:$0xff]  }
 0xc96   :  { %2113 = vmatprep.subr.bf16.mxu0 %v2328_v15  ;;  %v1237_v46 = vpop.permute.xlu1 %1236 }
 0xc9b   :  { %2090 = vmatmul.mubr.msk.f32.vlgmr.msra.gmra.mrb[10].mxu1 %vm186_vm2, %v1029_v30 }
 0xc9c   :  { %2104 = vmatmul.mubr.msk.f32.vlgmr.msra.gmra.mrb[2].mxu0 %vm186_vm2, %v1237_v46 }
 0xc9d   :  { %2117 = vmatprep.mubr.msk.bf16.mxu0 %vm2329_vm1, %v2328_v15  ;;  %2114 = vmatpush3.bf16.msra.mxu0 %v2252_v44 }
 0xc9e   :  { %2115 = vmatprep.subr.bf16.mxu0 %v2328_v15 }
 0xca1   :  { %2116 = vmatpush3.bf16.msra.mxu0 %v2253_v41 }
 0xca2   :  { %2129 = vmatprep.subr.bf16.mxu0 %v2328_v15 }
 0xd6e   :  { %v2091_v47 = vpop.f32.mrb[10].mxu1 }
 0xd6f   :  { %v1122_v49 = vmul.f32 0.25, %v2091_v47  ;;  %v2105_v51 = vpop.f32.mrb[2].mxu0  ;;  %v1112_v52 = vpop.f32.mrb[11].mxu1 }
 0xd70   :  { %v1121_v53 = vmul.f32 0.25, %v1112_v52  ;;  %v1316_v56 = vpop.f32.mrb[3].mxu0  ;;  %v1326_v50 = vmul.f32 0.25, %v2105_v51 }
 0xd71   :  { %v1325_v57 = vmul.f32 0.25, %v1316_v56  ;;  %v1124_v48 = vadd.f32 %v1122_v49, %v2500_v54 }
 0xd72   :  { %v1123_v60 = vadd.f32 %v1121_v53, %v2505_v58  ;;  %v1328_v0 = vadd.f32 %v1326_v50, %v2500_v54  ;;  %v1915_v50 = vld [vmem:[%s2770_s7 + $0x1] ss:$0 sm:$0xff] }
 0xd73   :  { %v1128_v55 = vsel %vm186_vm2, %v1124_v48, -inf  ;;  %v1327_v61 = vadd.f32 %v1325_v57, %v2505_v58 }
 0xd74   :  { %1129 = vmax.xlane.f32.xlu0 %v1128_v55  ;;  %v1125_v62 = vsel %vm186_vm2, %v1123_v60, -inf  ;;  %v1332_v1 = vsel %vm186_vm2, %v1328_v0, -inf }
 0xd75   :  { %1126 = vmax.xlane.f32.xlu1 %v1125_v62  ;;  %v1329_v63 = vsel %vm186_vm2, %v1327_v61, -inf }
 0xd78   :  { %1330 = vmax.xlane.f32.xlu0 %v1329_v63 }
 0xd7c   :  { %1333 = vmax.xlane.f32.xlu0 %v1332_v1 }
 0xe01   :  { %v1130_v2 = vpop.xlane.xlu0 %1129 }
 0xe02   :  { %v1132_v3 = vsub.f32 %v1124_v48, %v1130_v2  ;;  %v1127_v4 = vpop.xlane.xlu1 %1126 }
 0xe03   :  { %v1131_v5 = vsub.f32 %v1123_v60, %v1127_v4 }
 0xe04   :  { %v1135_v6 = vmul.f32 1.442695, %v1132_v3 }
 0xe05   :  { %v1133_v7 = vmul.f32 1.442695, %v1131_v5  ;;  %v1331_v40 = vpop.xlane.xlu0 %1330 }
 0xe06   :  { %2296 = vpow2.f32 %v1135_v6  ;;  %v1335_v58 = vsub.f32 %v1327_v61, %v1331_v40 }
 0xe07   :  { %2298 = vpow2.f32 %v1133_v7 }
 0xe08   :  { %v1337_v42 = vmul.f32 1.442695, %v1335_v58 }
 0xe09   :  { %v1334_v8 = vpop.xlane.xlu0 %1333 }
 0xe0a   :  { %2300 = vpow2.f32 %v1337_v42  ;;  %v1336_v9 = vsub.f32 %v1328_v0, %v1334_v8 }
 0xe0c   :  { %v1339_v10 = vmul.f32 1.442695, %v1336_v9 }
 0xe0e   :  { %2302 = vpow2.f32 %v1339_v10 }
 0xe10   :  { %v2297_v54 = vpop.eup %2296 }
 0xe11   :  { %v2299_v11 = vpop.eup %2298  ;;  %v1140_v12 = vsel %vm186_vm2, %v2297_v54, 0.0 }
 0xe12   :  { %1141 = vadd.xlane.f32.xlu0 %v1140_v12  ;;  %v1137_v13 = vsel %vm186_vm2, %v2299_v11, 0.0 }
 0xe13   :  { %1138 = vadd.xlane.f32.xlu1 %v1137_v13 }
 0xe14   :  { %v2301_v14 = vpop.eup %2300 }
 0xe15   :  { %v1341_v16 = vsel %vm186_vm2, %v2301_v14, 0.0 }
 0xe17   :  { %1342 = vadd.xlane.f32.xlu1 %v1341_v16 }
 0xe18   :  { %v2303_v17 = vpop.eup %2302 }
 0xe19   :  { %v1344_v18 = vsel %vm186_vm2, %v2303_v17, 0.0 }
 0xe1a   :  { %1345 = vadd.xlane.f32.xlu0 %v1344_v18 }
 0xe28   :  { %2226 = vrot.lane.b32.xlu1 %v2630_v34, %s2334_s22 }
 0xe30   :  { %2231 = vrot.lane.b32.xlu0 %v2630_v34, %s2333_s1 }
 0xe9f   :  { %v1142_v19 = vpop.xlane.xlu0 %1141 }
 0xea0   :  { %v1139_v20 = vpop.xlane.xlu1 %1138 }
 0xea1   :  { %2304 = vrcp.f32 %v1139_v20  ;;  %v1921_v20 = vld [vmem:[%s2772_s8 + $0x1] ss:$0 sm:$0xff] }
 0xea2   :  { %2306 = vrcp.f32 %v1142_v19 }
 0xea4   :  { %v1343_v21 = vpop.xlane.xlu1 %1342 }
 0xea5   :  { %2308 = vrcp.f32 %v1343_v21 }
 0xea7   :  { %v1346_v22 = vpop.xlane.xlu0 %1345 }
 0xea8   :  { %2310 = vrcp.f32 %v1346_v22  ;;  %v2227_v31 = vpop.permute.xlu1 %2226 }
 0xea9   :  { %v2229_v24 = vunpack.i.h.bf16 %v2227_v31  ;;  %v2228_v25 = vunpack.i.l.bf16 %v2227_v31 }
 0xeab   :  { %v2305_v26 = vpop.eup %2304  ;;  %v2167_v27 = vpack.c.bf16 %v2229_v24, %v2228_v25  ;;  %v2232_v28 = vpop.permute.xlu0 %2231  ;;  %v1922_v25 = vld [vmem:[%s2773_s9 + $0x1] ss:$0 sm:$0xff] }
 0xeac   :  { %v2307_v29 = vpop.eup %2306  ;;  %v2234_v30 = vunpack.i.h.bf16 %v2232_v28  ;;  %v2233_v33 = vunpack.i.l.bf16 %v2232_v28  ;;  %v1145_v35 = vmul.f32 %v2305_v26, %v2299_v11  ;;  %v2255_v11 = vld [vmem:[%s2771_s10 + $0x18] sm:$0xff]  }
 0xead   :  { %2168 = vmatprep.subr.bf16.mxu1 %v2167_v27  ;;  %v1146_v37 = vmul.f32 %v2307_v29, %v2297_v54 }
 0xeae   :  { %v2177_v34 = vpack.c.bf16 %v2234_v30, %v2233_v33  ;;  %2170 = vmatpush3.bf16.msra.mxu1 %v2167_v27  ;;  %2096 = vmatprep.mubr.msk.f32.mxu1 %vm186_vm2, %v1145_v35  ;;  %v2256_v30 = vld [vmem:[%s2774_s12 + $0x20] sm:$0xff]   ;;  %v2257_v33 = vld [vmem:[%s2774_s12 + $0x28] sm:$0xff]   ;;  %v2258_v35 = vld [vmem:[%s2774_s12 + $0x30] sm:$0xff]  }
 0xeaf   :  { %v2309_v36 = vpop.eup %2308 }
 0xeb0   :  { %2178 = vmatprep.subr.bf16.mxu1 %v2177_v34  ;;  %v1349_v38 = vmul.f32 %v2309_v36, %v2301_v14  ;;  %v1928_v36 = vld [vmem:[%s2775_s11 + $0x1] ss:$0 sm:$0xff] }
 0xeb1   :  { %2097 = vmatmul.mubr.msk.f32.vlgmr.msra.gmra.mrb[20].mxu1 %vm186_vm2, %v1146_v37 }
 0xeb2   :  { %v2311_v39 = vpop.eup %2310  ;;  %2180 = vmatpush3.bf16.msra.mxu1 %v2177_v34  ;;  %2110 = vmatprep.mubr.msk.f32.mxu1 %vm186_vm2, %v1349_v38  ;;  %v2259_v34 = vld [vmem:[%s2774_s12 + $0x38] sm:$0xff]  }
 0xeb3   :  { %v1350_v43 = vmul.f32 %v2311_v39, %v2303_v17  ;;  %2121 = vmatprep.subr.bf16.mxu1 %v2328_v15 }
 0xeb5   :  { %2111 = vmatmul.mubr.msk.f32.vlgmr.msra.gmra.mrb[22].mxu1 %vm186_vm2, %v1350_v43 }
 0xeb6   :  { %2125 = vmatprep.mubr.msk.bf16.mxu1 %vm2329_vm1, %v2328_v15 }
 0xf84   :  { %v2098_v45 = vpop.f32.mrb[20].mxu1 }
 0xf85   :  { %v1225_v46 = vpop.f32.mrb[21].mxu1 }
 0xf88   :  { %v2112_v47 = vpop.f32.mrb[22].mxu1 }
 0xf89   :  { %v1429_v49 = vpop.f32.mrb[23].mxu1 }
 0xf8a   :  { %v2235_v51 = vpack.i.bf16 %v2112_v47, %v1429_v49 }
 0xf8c   :  { %2236 = vrot.lane.b32.xlu1 %v2235_v51, %s2335_s26 }
 0xffe   :  { %v2237_v52 = vpop.permute.xlu1 %2236 }
 0xfff   :  { %v2239_v53 = vunpack.i.h.bf16 %v2237_v52  ;;  %v2238_v56 = vunpack.i.l.bf16 %v2237_v52 }
0x1001   :  { %v1447_v57 = vsel %vm186_vm2, %v2098_v45, %v2239_v53  ;;  %v1446_v48 = vsel %vm186_vm2, %v1225_v46, %v2238_v56 }
0x1002   :  { %v1448_v60 = vpack.c.bf16 %v1447_v57, %v1446_v48 }
0x1004   :  { %2118 = vmatmul.mubr.msk.bf16.vlgmr.msra.gmra.mrb[12].mxu0 %vm66_vm0, %v1448_v60 }
0x1005   :  { %2137 = vmatprep.mubr.msk.bf16.mxu0 %vm2329_vm1, %v2328_v15  ;;  %2130 = vmatpush3.bf16.msra.mxu0 %v2256_v30  ;;  %v1941_v30 = vld [vmem:[%s2776_s13 + $0x1] ss:$0 sm:$0xff] }
0x1006   :  { %2131 = vmatprep.subr.bf16.mxu0 %v2328_v15 }
0x1009   :  { %2132 = vmatpush3.bf16.msra.mxu0 %v2257_v33 }
0x100a   :  { %2133 = vmatprep.subr.bf16.mxu0 %v2328_v15 }
0x100d   :  { %2134 = vmatpush3.bf16.msra.mxu0 %v2258_v35 }
0x100e   :  { %2135 = vmatprep.subr.bf16.mxu0 %v2328_v15 }
0x1011   :  { %2136 = vmatpush3.bf16.msra.mxu0 %v2259_v34 }
0x10d7   :  { %v1511_v55 = vpop.f32.mrb[12].mxu0 }
0x10d8   :  { %v1512_v61 = vadd.f32 %v1915_v50, %v1511_v55  ;;  %v2119_v62 = vpop.f32.mrb[13].mxu0 }
0x10d9   :  { %v1514_v63 = vpop.f32.mrb[14].mxu0 }
0x10da   :  { %v1515_v0 = vadd.f32 %v1915_v50, %v1514_v63  ;;  %v2120_v1 = vpop.f32.mrb[15].mxu0  ;;  %v1518_v2 = vadd.f32 %v1512_v61, %v2619_v32 }
0x10dc   :  { %v1524_v3 = vsel %vm66_vm0, %v1518_v2, 0.0  ;;  %v1519_v4 = vadd.f32 %v1515_v0, %v2621_v23  ;;  %v2254_v23 = vld [vmem:[%s2771_s10 + $0x10] sm:$0xff]  }
0x10dd   :  { %1525 = vadd.xlane.f32.xlu1 %v1524_v3  ;;  %2122 = vmatpush3.bf16.msra.mxu1 %v2254_v23 }
0x10de   :  { %v1527_v5 = vsel %vm66_vm0, %v1519_v4, 0.0  ;;  %2123 = vmatprep.subr.bf16.mxu1 %v2328_v15 }
0x10df   :  { %1528 = vadd.xlane.f32.xlu0 %v1527_v5 }
0x10e1   :  { %2124 = vmatpush3.bf16.msra.mxu1 %v2255_v11 }
0x116a   :  { %v1526_v6 = vpop.xlane.xlu1 %1525 }
0x116b   :  { %v1530_v7 = vmul.f32 0.03125, %v1526_v6 }
0x116c   :  { %v1529_v40 = vpop.xlane.xlu0 %1528 }
0x116d   :  { %v1532_v58 = vsub.f32 %v1518_v2, %v1530_v7  ;;  %v1531_v42 = vmul.f32 0.03125, %v1529_v40 }
0x116f   :  { %v1533_v8 = vsub.f32 %v1519_v4, %v1531_v42  ;;  %v1534_v9 = vmul.f32 %v1532_v58, %v1532_v58 }
0x1171   :  { %v1536_v10 = vsel %vm66_vm0, %v1534_v9, 0.0  ;;  %v1535_v54 = vmul.f32 %v1533_v8, %v1533_v8 }
0x1172   :  { %1537 = vadd.xlane.f32.xlu0 %v1536_v10 }
0x1173   :  { %v1539_v32 = vsel %vm66_vm0, %v1535_v54, 0.0 }
0x1174   :  { %1540 = vadd.xlane.f32.xlu1 %v1539_v32 }
0x11ff   :  { %v1538_v12 = vpop.xlane.xlu0 %1537 }
0x1200   :  { %v1542_v13 = vmul.f32 0.03125, %v1538_v12 }
0x1201   :  { %v1541_v14 = vpop.xlane.xlu1 %1540 }
0x1202   :  { %v1544_v16 = vadd.f32 1e-12, %v1542_v13  ;;  %v1543_v17 = vmul.f32 0.03125, %v1541_v14 }
0x1204   :  { %2312 = vrsqrt.f32 %v1544_v16  ;;  %v1545_v18 = vadd.f32 1e-12, %v1543_v17 }
0x1206   :  { %2314 = vrsqrt.f32 %v1545_v18 }
0x120e   :  { %v2313_v19 = vpop.eup %2312 }
0x120f   :  { %v1548_v21 = vmul.f32 %v2313_v19, %v1532_v58 }
0x1210   :  { %v2315_v22 = vpop.eup %2314 }
0x1211   :  { %v1556_v31 = vmul.f32 %v1921_v20, %v1548_v21  ;;  %v1549_v24 = vmul.f32 %v2315_v22, %v1533_v8 }
0x1213   :  { %v1557_v26 = vmul.f32 %v1921_v20, %v1549_v24  ;;  %v2711_v27 = vadd.f32 %v1922_v25, %v1556_v31 }
0x1215   :  { %v2713_v28 = vadd.f32 %v1922_v25, %v1557_v26 }
0x1217   :  { %v1566_v29 = vpack.c.bf16 %v2713_v28, %v2711_v27 }
0x1219   :  { %2126 = vmatmul.mubr.msk.bf16.vlgmr.msra.gmra.mrb[24].mxu1 %vm66_vm0, %v1566_v29 }
0x12ec   :  { %v1629_v37 = vpop.f32.mrb[24].mxu1 }
0x12ed   :  { %v1630_v38 = vadd.f32 %v1928_v36, %v1629_v37  ;;  %v2127_v39 = vpop.f32.mrb[25].mxu1 }
0x12ee   :  { %v1632_v43 = vpop.f32.mrb[26].mxu1 }
0x12ef   :  { %v1638_v44 = vmul.f32 0.70710677, %v1630_v38  ;;  %v1633_v41 = vadd.f32 %v1928_v36, %v1632_v43  ;;  %v2128_v45 = vpop.f32.mrb[27].mxu1  ;;  %v1636_v22 = vmul.f32 0.5, %v1630_v38 }
0x12f1   :  { %vm1640_vm7 = vcmp.lt.f32.partialorder %v1638_v44, 0.0  ;;  %v1639_v46 = vmul.f32 0.70710677, %v1633_v41  ;;  %v1637_v31 = vmul.f32 0.5, %v1633_v41 }
0x12f2   :  { %v1642_v15 = vsel %vm1640_vm7, -1.0, %v2336_v59 }
0x12f3   :  { %v1644_v47 = vmul.f32 %v1642_v15, %v1638_v44  ;;  %vm1641_vm8 = vcmp.lt.f32.partialorder %v1639_v46, 0.0 }
0x12f4   :  { %v1643_v49 = vsel %vm1641_vm8, -1.0, %v2336_v59 }
0x12f5   :  { %v1646_v51 = vmul.f32 0.3275911, %v1644_v47  ;;  %v1645_v52 = vmul.f32 %v1643_v49, %v1639_v46  ;;  %v1670_v48 = vsub.f32 0.0, %v1644_v47 }
0x12f7   :  { %v1648_v53 = vadd.f32 1.0, %v1646_v51  ;;  %v1647_v56 = vmul.f32 0.3275911, %v1645_v52  ;;  %v1671_v60 = vsub.f32 0.0, %v1645_v52  ;;  %v1672_v55 = vmul.f32 %v1670_v48, %v1644_v47 }
0x12f9   :  { %2316 = vrcp.f32 %v1648_v53  ;;  %v1649_v57 = vadd.f32 1.0, %v1647_v56  ;;  %v1673_v0 = vmul.f32 %v1671_v60, %v1645_v52  ;;  %v1674_v1 = vmul.f32 1.442695, %v1672_v55 }
0x12fb   :  { %2318 = vrcp.f32 %v1649_v57  ;;  %v1676_v5 = vmul.f32 1.442695, %v1673_v0 }
0x12fc   :  { %2320 = vpow2.f32 %v1674_v1  ;;  %v1949_v1 = vld [vmem:[%s2777_s14 + $0x1] ss:$0 sm:$0xff] }
0x12fd   :  { %2322 = vpow2.f32 %v1676_v5 }
0x1303   :  { %v2317_v50 = vpop.eup %2316 }
0x1304   :  { %v1652_v61 = vmul.f32 1.0614054, %v2317_v50 }
0x1305   :  { %v2319_v62 = vpop.eup %2318 }
0x1306   :  { %v1654_v63 = vadd.f32 -1.4531521, %v1652_v61  ;;  %v1653_v2 = vmul.f32 1.0614054, %v2319_v62  ;;  %v2321_v23 = vpop.eup %2320 }
0x1307   :  { %v2323_v14 = vpop.eup %2322 }
0x1308   :  { %v1656_v3 = vmul.f32 %v2317_v50, %v1654_v63  ;;  %v1655_v4 = vadd.f32 -1.4531521, %v1653_v2 }
0x130a   :  { %v1658_v59 = vadd.f32 1.4214138, %v1656_v3  ;;  %v1657_v6 = vmul.f32 %v2319_v62, %v1655_v4 }
0x130c   :  { %v1660_v7 = vmul.f32 %v2317_v50, %v1658_v59  ;;  %v1659_v40 = vadd.f32 1.4214138, %v1657_v6  ;;  %v1950_v59 = vld [vmem:[%s2778_s15 + $0x1] ss:$0 sm:$0xff] }
0x130e   :  { %v1662_v58 = vadd.f32 -0.28449672, %v1660_v7  ;;  %v1661_v42 = vmul.f32 %v2319_v62, %v1659_v40  ;;  %v1951_v40 = vld [vmem:[%s2780_s16] ss:$0 sm:$0xff] }
0x1310   :  { %v1664_v8 = vmul.f32 %v2317_v50, %v1662_v58  ;;  %v1663_v9 = vadd.f32 -0.28449672, %v1661_v42 }
0x1312   :  { %v1666_v10 = vadd.f32 0.2548296, %v1664_v8  ;;  %v1665_v54 = vmul.f32 %v2319_v62, %v1663_v9 }
0x1314   :  { %v1668_v32 = vmul.f32 %v2317_v50, %v1666_v10  ;;  %v1667_v11 = vadd.f32 0.2548296, %v1665_v54 }
0x1316   :  { %v1678_v12 = vmul.f32 %v2321_v23, %v1668_v32  ;;  %v1669_v13 = vmul.f32 %v2319_v62, %v1667_v11 }
0x1318   :  { %v1680_v16 = vsub.f32 1.0, %v1678_v12  ;;  %v1679_v17 = vmul.f32 %v2323_v14, %v1669_v13 }
0x131a   :  { %v1682_v18 = vmul.f32 %v1680_v16, %v1642_v15  ;;  %v1681_v19 = vsub.f32 1.0, %v1679_v17 }
0x131c   :  { %v1684_v20 = vadd.f32 1.0, %v1682_v18  ;;  %v1683_v21 = vmul.f32 %v1681_v19, %v1643_v49 }
0x131e   :  { %v1685_v24 = vadd.f32 1.0, %v1683_v21  ;;  %v1686_v25 = vmul.f32 %v1684_v20, %v1636_v22 }
0x1320   :  { %v1687_v26 = vmul.f32 %v1685_v24, %v1637_v31 }
0x1322   :  { %v1688_v29 = vpack.c.bf16 %v1687_v26, %v1686_v25 }
0x1324   :  { %2138 = vmatmul.mubr.msk.bf16.vlgmr.msra.gmra.mrb[16].mxu0 %vm871_vm6, %v1688_v29 }
0x13f7   :  { %v1767_v33 = vpop.f32.mrb[16].mxu0 }
0x13f8   :  { %v1768_v35 = vadd.f32 %v1941_v30, %v1767_v33  ;;  %v2139_v34 = vpop.f32.mrb[17].mxu0 }
0x13f9   :  { %v1770_v36 = vpop.f32.mrb[18].mxu0 }
0x13fa   :  { %v1771_v37 = vadd.f32 %v1941_v30, %v1770_v36  ;;  %v2140_v39 = vpop.f32.mrb[19].mxu0  ;;  %v1774_v43 = vadd.f32 %v1768_v35, %v2711_v27 }
0x13fc   :  { %v1780_v38 = vsel %vm66_vm0, %v1774_v43, 0.0  ;;  %v1775_v44 = vadd.f32 %v1771_v37, %v2713_v28  ;;  %v23_v28 = vstv %s2779_s17 }
0x13fd   :  { %1781 = vadd.xlane.f32.xlu1 %v1780_v38  ;;  %24 = vst [vmem:[#allocation2] sm:$0x1] %v23_v28 }
0x13fe   :  { %v1783_v41 = vsel %vm66_vm0, %v1775_v44, 0.0 }
0x13ff   :  { %1784 = vadd.xlane.f32.xlu0 %v1783_v41 }
0x1404   :  { %v1952_v9 = vld [vmem:[#allocation2] ss:$0 sm:$0xff] }
0x148a   :  { %v1782_v45 = vpop.xlane.xlu1 %1781 }
0x148b   :  { %v1786_v46 = vmul.f32 0.03125, %v1782_v45 }
0x148c   :  { %v1785_v15 = vpop.xlane.xlu0 %1784 }
0x148d   :  { %v1788_v47 = vsub.f32 %v1774_v43, %v1786_v46  ;;  %v1787_v49 = vmul.f32 0.03125, %v1785_v15 }
0x148f   :  { %v1789_v51 = vsub.f32 %v1775_v44, %v1787_v49  ;;  %v1790_v52 = vmul.f32 %v1788_v47, %v1788_v47 }
0x1491   :  { %v1792_v53 = vsel %vm66_vm0, %v1790_v52, 0.0  ;;  %v1791_v56 = vmul.f32 %v1789_v51, %v1789_v51 }
0x1492   :  { %1793 = vadd.xlane.f32.xlu1 %v1792_v53 }
0x1493   :  { %v1795_v27 = vsel %vm66_vm0, %v1791_v56, 0.0 }
0x1494   :  { %1796 = vadd.xlane.f32.xlu0 %v1795_v27 }
0x151f   :  { %v1794_v57 = vpop.xlane.xlu1 %1793 }
0x1520   :  { %v1798_v48 = vmul.f32 0.03125, %v1794_v57 }
0x1521   :  { %v1797_v60 = vpop.xlane.xlu0 %1796 }
0x1522   :  { %v1800_v50 = vadd.f32 1e-12, %v1798_v48  ;;  %v1799_v55 = vmul.f32 0.03125, %v1797_v60 }
0x1524   :  { %2324 = vrsqrt.f32 %v1800_v50  ;;  %v1801_v61 = vadd.f32 1e-12, %v1799_v55 }
0x1526   :  { %2326 = vrsqrt.f32 %v1801_v61 }
0x152e   :  { %v2325_v62 = vpop.eup %2324 }
0x152f   :  { %v1804_v63 = vmul.f32 %v2325_v62, %v1788_v47 }
0x1530   :  { %v2327_v0 = vpop.eup %2326 }
0x1531   :  { %v1805_v2 = vmul.f32 %v2327_v0, %v1789_v51  ;;  %v1812_v3 = vmul.f32 %v1949_v1, %v1804_v63 }
0x1533   :  { %v1813_v4 = vmul.f32 %v1949_v1, %v1805_v2  ;;  %v1820_v6 = vadd.f32 %v1950_v59, %v1812_v3 }
0x1535   :  { %v1821_v5 = vadd.f32 %v1950_v59, %v1813_v4 }
0x1537   :  { %v1823_v7 = vrot.slane %v1821_v5, 7 }
0x1539   :  { %v1826_v58 = vsel %vm1825_vm9, %v1820_v6, %v1823_v7 }
0x153a   :  { %v1834_v42 = vmul.f32 %v1951_v40, %v1826_v58 }
0x153c   :  { %v1836_v8 = vsel %vm1835_vm10, %v1834_v42, 0.0 }
0x153d   :  { %1837 = vadd.xlane.f32.xlu0 %v1836_v8 }
0x15ca   :  { %v1838_v10 = vpop.xlane.xlu0 %1837 }
0x15cb   :  { %v1846_v54 = vadd.f32 %v1952_v9, %v1838_v10 }
0x15cd   :  { %1848 = vst.msk [vmem:[%s2781_s18] sm:$0x3] %vm1847_vm11, %v1846_v54 }

</bundles_post_ra>
